<compile_context>
chip_gen: v7x
topology: tpu7x:2x2x1
jax: 0.10.0
libtpu: 0.0.40
codegen_flags: <defaults>
</compile_context>

<pallas_src>
import jax
import jax.numpy as jnp
from jax import lax
from jax.experimental import pallas as pl
from jax.experimental.pallas import tpu as pltpu


def _round_up(x, m):
    return (x + m - 1) // m * m


def sep_3dlayer_b_forward(x_ncdhw, w1_oidhw, b1, w2_oidhw, b2, *, block_d=4):
    """Pallas forward. x_ncdhw: (N, Cin, D, H, W) float32. Returns NCDHW."""
    N, Cin, D, H, W = x_ncdhw.shape
    Cout = w1_oidhw.shape[0]

    Td = block_d if (D % block_d == 0 and block_d <= D) else D  # depth tile
    DT = D // Td

    Cin_p = _round_up(Cin, 8)          # sublane-align channels
    Hp, Wp = H + 2, W + 2              # spatially padded extents
    L = Hp * Wp                        # flattened padded spatial length
    P0 = Wp + 1                        # leading flat pad -> all tap offsets >= 0
    Lx = _round_up(L + 2 * Wp + 2, 128)   # lane-tile aligned input row length

    # ---- input: ONE padded copy: (N, D+4, Cin_p, Lx), channels on sublanes,
    #      flattened padded spatial on lanes.
    xt = jnp.transpose(x_ncdhw, (0, 2, 1, 3, 4))                       # (N,D,Cin,H,W)
    xt = jnp.pad(xt, ((0, 0), (2, 2), (0, Cin_p - Cin), (1, 1), (1, 1)))
    xt = xt.reshape(N, D + 4, Cin_p, L)
    x_prep = jnp.pad(xt, ((0, 0), (0, 0), (0, 0), (P0, Lx - P0 - L)))
    x_prep = x_prep.astype(jnp.float32)

    # ---- weights: im2col-stacked (Cout, K) matrices, zero-padded channels ----
    w1_t = jnp.transpose(w1_oidhw[:, :, 0, :, :], (0, 2, 3, 1))        # (Cout,3,3,Cin)
    w1_t = jnp.pad(w1_t, ((0, 0), (0, 0), (0, 0), (0, Cin_p - Cin)))
    w1_cat = w1_t.reshape(Cout, 9 * Cin_p).astype(jnp.float32)
    w2_t = jnp.transpose(w2_oidhw[:, :, :, 0, 0], (0, 2, 1))           # (Cout,5,Cin)
    w2_t = jnp.pad(w2_t, ((0, 0), (0, 0), (0, Cin_p - Cin)))
    w2_cat = w2_t.reshape(Cout, 5 * Cin_p).astype(jnp.float32)
    b1_2d = b1.reshape(Cout, 1).astype(jnp.float32)
    b2_2d = b2.reshape(Cout, 1).astype(jnp.float32)

    # tap (kh, kw) of the [1,3,3] conv reads x_row[p + kh*Wp + kw] for output p
    spatial_offs = tuple(kh * Wp + kw for kh in range(3) for kw in range(3))

    def kernel(x_hbm, w1_ref, w2_ref, b1_ref, b2_ref, o_ref, xwin, patch, sem):
        n = pl.program_id(0)
        dt = pl.program_id(1)
        cur = lax.rem(dt, 2)
        nxt = lax.rem(dt + 1, 2)

        def fetch(dtile, slot):
            start = pl.multiple_of(dtile * Td, Td)
            pltpu.make_async_copy(
                x_hbm.at[n, pl.ds(start, Td + 4)],
                xwin.at[slot],
                sem.at[slot]).start()

        # Prime the chain at the first depth tile of this batch element.
        @pl.when(dt == 0)
        def _():
            fetch(dt, cur)

        # Prefetch the next depth tile's window; it overlaps with this step's
        # compute and is waited on at step dt+1.
        @pl.when(dt + 1 < DT)
        def _():
            fetch(dt + 1, nxt)

        # Wait for the current window (started here if dt==0, else at dt-1).
        pltpu.make_async_copy(
            x_hbm.at[n, pl.ds(pl.multiple_of(dt * Td, Td), Td + 4)],
            xwin.at[cur],
            sem.at[cur]).wait()

        xcur = xwin.at[cur]         # (Td+4, Cin_p, Lx) view of the live slot
        w1 = w1_ref[...]            # (Cout, 9*Cin_p)
        w2 = w2_ref[...]            # (Cout, 5*Cin_p)
        bias1 = b1_ref[...]         # (Cout, 1)
        bias2 = b2_ref[...]         # (Cout, 1)

        # im2col for the [1,3,3] conv, built once for all Td output depths:
        # rows (tap, channel) on sublanes (8-aligned), positions on lanes.
        for t, off in enumerate(spatial_offs):
            patch[:, t * Cin_p:(t + 1) * Cin_p, :] = \
                xcur[2:2 + Td, :, off:off + L]

        for j in range(Td):         # static unroll over the depth tile
            # conv_1 branch: single fused matmul + bias + ReLU
            d1 = jnp.dot(w1, patch[j], preferred_element_type=jnp.float32)
            d1 = jnp.maximum(d1 + bias1, 0.0)
            # conv_2 branch: 5-deep window, tile-aligned collapse, one matmul
            p2 = xcur[j:j + 5].reshape(5 * Cin_p, Lx)[:, P0:P0 + L]
            d2 = jnp.dot(w2, p2, preferred_element_type=jnp.float32) + bias2
            o_ref[0, j] = (d1 + d2).astype(o_ref.dtype)

    flops = 2 * N * D * L * 14 * Cin_p * Cout
    bytes_accessed = 4 * (x_prep.size + w1_cat.size + w2_cat.size
                          + 2 * Cout + N * D * Cout * L)

    out_flat = pl.pallas_call(
        kernel,
        out_shape=jax.ShapeDtypeStruct((N, D, Cout, L), jnp.float32),
        grid_spec=pltpu.PrefetchScalarGridSpec(
            num_scalar_prefetch=0,
            grid=(N, DT),
            in_specs=[
                pl.BlockSpec(memory_space=pl.ANY),                 # x stays in HBM
                pl.BlockSpec((Cout, 9 * Cin_p), lambda n, d: (0, 0)),
                pl.BlockSpec((Cout, 5 * Cin_p), lambda n, d: (0, 0)),
                pl.BlockSpec((Cout, 1), lambda n, d: (0, 0)),
                pl.BlockSpec((Cout, 1), lambda n, d: (0, 0)),
            ],
            out_specs=pl.BlockSpec((1, Td, Cout, L),
                                   lambda n, d: (n, d, 0, 0)),
            scratch_shapes=[
                pltpu.VMEM((2, Td + 4, Cin_p, Lx), jnp.float32),   # dbl-buf window
                pltpu.VMEM((Td, 9 * Cin_p, L), jnp.float32),       # im2col patches
                pltpu.SemaphoreType.DMA((2,)),
            ],
        ),
        compiler_params=pltpu.CompilerParams(
            # batch axis parallel (megacore); depth-tile axis sequential so the
            # manual prefetch chain (prime at dt==0, prefetch dt+1) stays valid.
            dimension_semantics=("parallel", "arbitrary"),
            vmem_limit_bytes=32 * 1024 * 1024,
        ),
        cost_estimate=pl.CostEstimate(
            flops=flops, transcendentals=0, bytes_accessed=bytes_accessed),
    )(x_prep, w1_cat, w2_cat, b1_2d, b2_2d)

    # glue: drop the padded border positions and go back to NCDHW
    out = out_flat.reshape(N, D, Cout, Hp, Wp)[:, :, :, 1:1 + H, 1:1 + W]
    return jnp.transpose(out, (0, 2, 1, 3, 4))


def ref_forward(x, w1, b1, w2, b2):
    """Pure-JAX reference matching the PyTorch module (stride=1, no pooling)."""
    dn = ("NCDHW", "OIDHW", "NCDHW")
    d1 = lax.conv_general_dilated(x, w1, window_strides=(1, 1, 1),
                                  padding=((0, 0), (1, 1), (1, 1)),
                                  dimension_numbers=dn)
    d1 = jnp.maximum(d1 + b1[None, :, None, None, None], 0.0)
    d2 = lax.conv_general_dilated(x, w2, window_strides=(1, 1, 1),
                                  padding=((2, 2), (0, 0), (0, 0)),
                                  dimension_numbers=dn)
    d2 = d2 + b2[None, :, None, None, None]
    return d1 + d2


if __name__ == "__main__":
    # small shapes consistent with the module's NCDHW input
    N, Cin, Cout, D, H, W = 2, 4, 8, 8, 16, 16

    key = jax.random.PRNGKey(0)
    kx, kw1, kb1, kw2, kb2 = jax.random.split(key, 5)

    x = jax.random.normal(kx, (N, Cin, D, H, W), jnp.float32)
    # Conv3d parameter layouts: OIDHW weights + per-channel biases
    w1 = 0.1 * jax.random.normal(kw1, (Cout, Cin, 1, 3, 3), jnp.float32)
    b1 = 0.1 * jax.random.normal(kb1, (Cout,), jnp.float32)
    w2 = 0.1 * jax.random.normal(kw2, (Cout, Cin, 5, 1, 1), jnp.float32)
    b2 = 0.1 * jax.random.normal(kb2, (Cout,), jnp.float32)

    out = jax.block_until_ready(
        sep_3dlayer_b_forward(x, w1, b1, w2, b2, block_d=4))
    ref = jax.block_until_ready(ref_forward(x, w1, b1, w2, b2))

    assert out.shape == (N, Cout, D, H, W)
    err = float(jnp.max(jnp.abs(out - ref)))
    assert err < 2e-4, err
    print("KERNEL_OK")
</pallas_src>

<mosaic_0001>
module attributes {stable_mosaic.version = 11 : i64} {
  func.func @kernel(%arg0: i32, %arg1: i32, %arg2: memref<2x12x8x384xf32, #tpu.memory_space<any>>, %arg3: memref<8x72xf32, #tpu.memory_space<vmem>>, %arg4: memref<8x40xf32, #tpu.memory_space<vmem>>, %arg5: memref<8x1xf32, #tpu.memory_space<vmem>>, %arg6: memref<8x1xf32, #tpu.memory_space<vmem>>, %arg7: memref<1x4x8x324xf32, #tpu.memory_space<vmem>>, %arg8: memref<2x8x8x384xf32, #tpu.memory_space<vmem>>, %arg9: memref<4x72x324xf32, #tpu.memory_space<vmem>>, %arg10: memref<2x!tpu.dma_semaphore, #tpu.memory_space<semaphore_mem>>) attributes {dimension_semantics = [#tpu.dimension_semantics<parallel>, #tpu.dimension_semantics<arbitrary>], iteration_bounds = array<i64: 2, 2>, scalar_prefetch = 0 : i64, scratch_operands = 3 : i64, tpu.core_type = #tpu.core_type<tc>, window_params = [{}, {pipeline_mode = #tpu.pipeline_mode<synchronous>, transform_indices = @transform_1, window_bounds = array<i64: 8, 72>}, {pipeline_mode = #tpu.pipeline_mode<synchronous>, transform_indices = @transform_2, window_bounds = array<i64: 8, 40>}, {pipeline_mode = #tpu.pipeline_mode<synchronous>, transform_indices = @transform_3, window_bounds = array<i64: 8, 1>}, {pipeline_mode = #tpu.pipeline_mode<synchronous>, transform_indices = @transform_4, window_bounds = array<i64: 8, 1>}, {transform_indices = @transform_5, window_bounds = array<i64: 1, 4, 8, 324>}]} {
    %c2_i32 = arith.constant 2 : i32
    %0 = arith.remsi %arg1, %c2_i32 : i32
    %c1_i32 = arith.constant 1 : i32
    %1 = arith.addi %arg1, %c1_i32 : i32
    %c2_i32_0 = arith.constant 2 : i32
    %2 = arith.remsi %1, %c2_i32_0 : i32
    %c0_i32 = arith.constant 0 : i32
    %3 = arith.cmpi eq, %arg1, %c0_i32 : i32
    %4 = arith.extui %3 : i1 to i32
    %c0_i32_1 = arith.constant 0 : i32
    %5 = arith.cmpi ne, %4, %c0_i32_1 : i32
    scf.if %5 {
      %c4_i32_144 = arith.constant 4 : i32
      %134 = arith.muli %arg1, %c4_i32_144 : i32
      %135 = tpu.assume_multiple %134, 4 : i32
      %c0_i32_145 = arith.constant 0 : i32
      %c0_i32_146 = arith.constant 0 : i32
      %136 = tpu.memref_slice %arg2[%arg0, %135, %c0_i32_145, %c0_i32_146] : memref<2x12x8x384xf32, #tpu.memory_space<any>> -> memref<1x8x8x384xf32, #tpu.memory_space<any>>
      %137 = tpu.memref_squeeze %136 : memref<1x8x8x384xf32, #tpu.memory_space<any>> -> memref<8x8x384xf32, #tpu.memory_space<any>>
      %c0_i32_147 = arith.constant 0 : i32
      %c0_i32_148 = arith.constant 0 : i32
      %c0_i32_149 = arith.constant 0 : i32
      %138 = tpu.memref_slice %arg8[%0, %c0_i32_147, %c0_i32_148, %c0_i32_149] : memref<2x8x8x384xf32, #tpu.memory_space<vmem>> -> memref<1x8x8x384xf32, #tpu.memory_space<vmem>>
      %139 = tpu.memref_squeeze %138 : memref<1x8x8x384xf32, #tpu.memory_space<vmem>> -> memref<8x8x384xf32, #tpu.memory_space<vmem>>
      %140 = tpu.memref_slice %arg10[%0] : memref<2x!tpu.dma_semaphore, #tpu.memory_space<semaphore_mem>> -> memref<1x!tpu.dma_semaphore, #tpu.memory_space<semaphore_mem>>
      %141 = tpu.memref_squeeze %140 : memref<1x!tpu.dma_semaphore, #tpu.memory_space<semaphore_mem>> -> memref<!tpu.dma_semaphore, #tpu.memory_space<semaphore_mem>>
      tpu.enqueue_dma source(%137 : memref<8x8x384xf32, #tpu.memory_space<any>>) target(%139 : memref<8x8x384xf32, #tpu.memory_space<vmem>>) target_semaphore(%141 : memref<!tpu.dma_semaphore, #tpu.memory_space<semaphore_mem>>)
    } else {
    }
    %c1_i32_2 = arith.constant 1 : i32
    %6 = arith.addi %arg1, %c1_i32_2 : i32
    %c2_i32_3 = arith.constant 2 : i32
    %7 = arith.cmpi slt, %6, %c2_i32_3 : i32
    %8 = arith.extui %7 : i1 to i32
    %c0_i32_4 = arith.constant 0 : i32
    %9 = arith.cmpi ne, %8, %c0_i32_4 : i32
    scf.if %9 {
      %c1_i32_144 = arith.constant 1 : i32
      %134 = arith.addi %arg1, %c1_i32_144 : i32
      %c4_i32_145 = arith.constant 4 : i32
      %135 = arith.muli %134, %c4_i32_145 : i32
      %136 = tpu.assume_multiple %135, 4 : i32
      %c0_i32_146 = arith.constant 0 : i32
      %c0_i32_147 = arith.constant 0 : i32
      %137 = tpu.memref_slice %arg2[%arg0, %136, %c0_i32_146, %c0_i32_147] : memref<2x12x8x384xf32, #tpu.memory_space<any>> -> memref<1x8x8x384xf32, #tpu.memory_space<any>>
      %138 = tpu.memref_squeeze %137 : memref<1x8x8x384xf32, #tpu.memory_space<any>> -> memref<8x8x384xf32, #tpu.memory_space<any>>
      %c0_i32_148 = arith.constant 0 : i32
      %c0_i32_149 = arith.constant 0 : i32
      %c0_i32_150 = arith.constant 0 : i32
      %139 = tpu.memref_slice %arg8[%2, %c0_i32_148, %c0_i32_149, %c0_i32_150] : memref<2x8x8x384xf32, #tpu.memory_space<vmem>> -> memref<1x8x8x384xf32, #tpu.memory_space<vmem>>
      %140 = tpu.memref_squeeze %139 : memref<1x8x8x384xf32, #tpu.memory_space<vmem>> -> memref<8x8x384xf32, #tpu.memory_space<vmem>>
      %141 = tpu.memref_slice %arg10[%2] : memref<2x!tpu.dma_semaphore, #tpu.memory_space<semaphore_mem>> -> memref<1x!tpu.dma_semaphore, #tpu.memory_space<semaphore_mem>>
      %142 = tpu.memref_squeeze %141 : memref<1x!tpu.dma_semaphore, #tpu.memory_space<semaphore_mem>> -> memref<!tpu.dma_semaphore, #tpu.memory_space<semaphore_mem>>
      tpu.enqueue_dma source(%138 : memref<8x8x384xf32, #tpu.memory_space<any>>) target(%140 : memref<8x8x384xf32, #tpu.memory_space<vmem>>) target_semaphore(%142 : memref<!tpu.dma_semaphore, #tpu.memory_space<semaphore_mem>>)
    } else {
    }
    %c4_i32 = arith.constant 4 : i32
    %10 = arith.muli %arg1, %c4_i32 : i32
    %11 = tpu.assume_multiple %10, 4 : i32
    %c0_i32_5 = arith.constant 0 : i32
    %c0_i32_6 = arith.constant 0 : i32
    %12 = tpu.memref_slice %arg2[%arg0, %11, %c0_i32_5, %c0_i32_6] : memref<2x12x8x384xf32, #tpu.memory_space<any>> -> memref<1x8x8x384xf32, #tpu.memory_space<any>>
    %13 = tpu.memref_squeeze %12 : memref<1x8x8x384xf32, #tpu.memory_space<any>> -> memref<8x8x384xf32, #tpu.memory_space<any>>
    %c0_i32_7 = arith.constant 0 : i32
    %c0_i32_8 = arith.constant 0 : i32
    %c0_i32_9 = arith.constant 0 : i32
    %14 = tpu.memref_slice %arg8[%0, %c0_i32_7, %c0_i32_8, %c0_i32_9] : memref<2x8x8x384xf32, #tpu.memory_space<vmem>> -> memref<1x8x8x384xf32, #tpu.memory_space<vmem>>
    %15 = tpu.memref_squeeze %14 : memref<1x8x8x384xf32, #tpu.memory_space<vmem>> -> memref<8x8x384xf32, #tpu.memory_space<vmem>>
    %16 = tpu.memref_slice %arg10[%0] : memref<2x!tpu.dma_semaphore, #tpu.memory_space<semaphore_mem>> -> memref<1x!tpu.dma_semaphore, #tpu.memory_space<semaphore_mem>>
    %17 = tpu.memref_squeeze %16 : memref<1x!tpu.dma_semaphore, #tpu.memory_space<semaphore_mem>> -> memref<!tpu.dma_semaphore, #tpu.memory_space<semaphore_mem>>
    tpu.wait_dma2 semaphore(%17 : memref<!tpu.dma_semaphore, #tpu.memory_space<semaphore_mem>>) src(%13 : memref<8x8x384xf32, #tpu.memory_space<any>>) dst(%15 : memref<8x8x384xf32, #tpu.memory_space<vmem>>)
    %c0 = arith.constant 0 : index
    %c0_10 = arith.constant 0 : index
    %18 = vector.load %arg3[%c0, %c0_10] : memref<8x72xf32, #tpu.memory_space<vmem>>, vector<8x72xf32>
    %c0_11 = arith.constant 0 : index
    %c0_12 = arith.constant 0 : index
    %19 = vector.load %arg4[%c0_11, %c0_12] : memref<8x40xf32, #tpu.memory_space<vmem>>, vector<8x40xf32>
    %c0_13 = arith.constant 0 : index
    %c0_14 = arith.constant 0 : index
    %20 = vector.load %arg5[%c0_13, %c0_14] : memref<8x1xf32, #tpu.memory_space<vmem>>, vector<8x1xf32>
    %c0_15 = arith.constant 0 : index
    %c0_16 = arith.constant 0 : index
    %21 = vector.load %arg6[%c0_15, %c0_16] : memref<8x1xf32, #tpu.memory_space<vmem>>, vector<8x1xf32>
    %c0_i32_17 = arith.constant 0 : i32
    %c0_i32_18 = arith.constant 0 : i32
    %c0_i32_19 = arith.constant 0 : i32
    %22 = tpu.memref_slice %arg8[%0, %c0_i32_17, %c0_i32_18, %c0_i32_19] : memref<2x8x8x384xf32, #tpu.memory_space<vmem>> -> memref<1x8x8x384xf32, #tpu.memory_space<vmem>>
    %23 = tpu.memref_squeeze %22 : memref<1x8x8x384xf32, #tpu.memory_space<vmem>> -> memref<8x8x384xf32, #tpu.memory_space<vmem>>
    %c2 = arith.constant 2 : index
    %c0_20 = arith.constant 0 : index
    %c0_21 = arith.constant 0 : index
    %24 = vector.load %23[%c2, %c0_20, %c0_21] : memref<8x8x384xf32, #tpu.memory_space<vmem>>, vector<4x8x324xf32>
    %c0_22 = arith.constant 0 : index
    %c0_23 = arith.constant 0 : index
    %c0_24 = arith.constant 0 : index
    %25 = vector.load %arg9[%c0_22, %c0_23, %c0_24] : memref<4x72x324xf32, #tpu.memory_space<vmem>>, vector<4x8x324xf32>
    tpu.vector_store %arg9[%c0_22, %c0_23, %c0_24], %24 {strides = array<i32>} : memref<4x72x324xf32, #tpu.memory_space<vmem>>, vector<4x8x324xf32>,
    %c0_i32_25 = arith.constant 0 : i32
    %c0_i32_26 = arith.constant 0 : i32
    %c0_i32_27 = arith.constant 0 : i32
    %26 = tpu.memref_slice %arg8[%0, %c0_i32_25, %c0_i32_26, %c0_i32_27] : memref<2x8x8x384xf32, #tpu.memory_space<vmem>> -> memref<1x8x8x384xf32, #tpu.memory_space<vmem>>
    %27 = tpu.memref_squeeze %26 : memref<1x8x8x384xf32, #tpu.memory_space<vmem>> -> memref<8x8x384xf32, #tpu.memory_space<vmem>>
    %c2_28 = arith.constant 2 : index
    %c0_29 = arith.constant 0 : index
    %c1 = arith.constant 1 : index
    %28 = vector.load %27[%c2_28, %c0_29, %c1] : memref<8x8x384xf32, #tpu.memory_space<vmem>>, vector<4x8x324xf32>
    %c0_30 = arith.constant 0 : index
    %c8 = arith.constant 8 : index
    %c0_31 = arith.constant 0 : index
    %29 = vector.load %arg9[%c0_30, %c8, %c0_31] : memref<4x72x324xf32, #tpu.memory_space<vmem>>, vector<4x8x324xf32>
    tpu.vector_store %arg9[%c0_30, %c8, %c0_31], %28 {strides = array<i32>} : memref<4x72x324xf32, #tpu.memory_space<vmem>>, vector<4x8x324xf32>,
    %c0_i32_32 = arith.constant 0 : i32
    %c0_i32_33 = arith.constant 0 : i32
    %c0_i32_34 = arith.constant 0 : i32
    %30 = tpu.memref_slice %arg8[%0, %c0_i32_32, %c0_i32_33, %c0_i32_34] : memref<2x8x8x384xf32, #tpu.memory_space<vmem>> -> memref<1x8x8x384xf32, #tpu.memory_space<vmem>>
    %31 = tpu.memref_squeeze %30 : memref<1x8x8x384xf32, #tpu.memory_space<vmem>> -> memref<8x8x384xf32, #tpu.memory_space<vmem>>
    %c2_35 = arith.constant 2 : index
    %c0_36 = arith.constant 0 : index
    %c2_37 = arith.constant 2 : index
    %32 = vector.load %31[%c2_35, %c0_36, %c2_37] : memref<8x8x384xf32, #tpu.memory_space<vmem>>, vector<4x8x324xf32>
    %c0_38 = arith.constant 0 : index
    %c16 = arith.constant 16 : index
    %c0_39 = arith.constant 0 : index
    %33 = vector.load %arg9[%c0_38, %c16, %c0_39] : memref<4x72x324xf32, #tpu.memory_space<vmem>>, vector<4x8x324xf32>
    tpu.vector_store %arg9[%c0_38, %c16, %c0_39], %32 {strides = array<i32>} : memref<4x72x324xf32, #tpu.memory_space<vmem>>, vector<4x8x324xf32>,
    %c0_i32_40 = arith.constant 0 : i32
    %c0_i32_41 = arith.constant 0 : i32
    %c0_i32_42 = arith.constant 0 : i32
    %34 = tpu.memref_slice %arg8[%0, %c0_i32_40, %c0_i32_41, %c0_i32_42] : memref<2x8x8x384xf32, #tpu.memory_space<vmem>> -> memref<1x8x8x384xf32, #tpu.memory_space<vmem>>
    %35 = tpu.memref_squeeze %34 : memref<1x8x8x384xf32, #tpu.memory_space<vmem>> -> memref<8x8x384xf32, #tpu.memory_space<vmem>>
    %c2_43 = arith.constant 2 : index
    %c0_44 = arith.constant 0 : index
    %c18 = arith.constant 18 : index
    %36 = vector.load %35[%c2_43, %c0_44, %c18] : memref<8x8x384xf32, #tpu.memory_space<vmem>>, vector<4x8x324xf32>
    %c0_45 = arith.constant 0 : index
    %c24 = arith.constant 24 : index
    %c0_46 = arith.constant 0 : index
    %37 = vector.load %arg9[%c0_45, %c24, %c0_46] : memref<4x72x324xf32, #tpu.memory_space<vmem>>, vector<4x8x324xf32>
    tpu.vector_store %arg9[%c0_45, %c24, %c0_46], %36 {strides = array<i32>} : memref<4x72x324xf32, #tpu.memory_space<vmem>>, vector<4x8x324xf32>,
    %c0_i32_47 = arith.constant 0 : i32
    %c0_i32_48 = arith.constant 0 : i32
    %c0_i32_49 = arith.constant 0 : i32
    %38 = tpu.memref_slice %arg8[%0, %c0_i32_47, %c0_i32_48, %c0_i32_49] : memref<2x8x8x384xf32, #tpu.memory_space<vmem>> -> memref<1x8x8x384xf32, #tpu.memory_space<vmem>>
    %39 = tpu.memref_squeeze %38 : memref<1x8x8x384xf32, #tpu.memory_space<vmem>> -> memref<8x8x384xf32, #tpu.memory_space<vmem>>
    %c2_50 = arith.constant 2 : index
    %c0_51 = arith.constant 0 : index
    %c19 = arith.constant 19 : index
    %40 = vector.load %39[%c2_50, %c0_51, %c19] : memref<8x8x384xf32, #tpu.memory_space<vmem>>, vector<4x8x324xf32>
    %c0_52 = arith.constant 0 : index
    %c32 = arith.constant 32 : index
    %c0_53 = arith.constant 0 : index
    %41 = vector.load %arg9[%c0_52, %c32, %c0_53] : memref<4x72x324xf32, #tpu.memory_space<vmem>>, vector<4x8x324xf32>
    tpu.vector_store %arg9[%c0_52, %c32, %c0_53], %40 {strides = array<i32>} : memref<4x72x324xf32, #tpu.memory_space<vmem>>, vector<4x8x324xf32>,
    %c0_i32_54 = arith.constant 0 : i32
    %c0_i32_55 = arith.constant 0 : i32
    %c0_i32_56 = arith.constant 0 : i32
    %42 = tpu.memref_slice %arg8[%0, %c0_i32_54, %c0_i32_55, %c0_i32_56] : memref<2x8x8x384xf32, #tpu.memory_space<vmem>> -> memref<1x8x8x384xf32, #tpu.memory_space<vmem>>
    %43 = tpu.memref_squeeze %42 : memref<1x8x8x384xf32, #tpu.memory_space<vmem>> -> memref<8x8x384xf32, #tpu.memory_space<vmem>>
    %c2_57 = arith.constant 2 : index
    %c0_58 = arith.constant 0 : index
    %c20 = arith.constant 20 : index
    %44 = vector.load %43[%c2_57, %c0_58, %c20] : memref<8x8x384xf32, #tpu.memory_space<vmem>>, vector<4x8x324xf32>
    %c0_59 = arith.constant 0 : index
    %c40 = arith.constant 40 : index
    %c0_60 = arith.constant 0 : index
    %45 = vector.load %arg9[%c0_59, %c40, %c0_60] : memref<4x72x324xf32, #tpu.memory_space<vmem>>, vector<4x8x324xf32>
    tpu.vector_store %arg9[%c0_59, %c40, %c0_60], %44 {strides = array<i32>} : memref<4x72x324xf32, #tpu.memory_space<vmem>>, vector<4x8x324xf32>,
    %c0_i32_61 = arith.constant 0 : i32
    %c0_i32_62 = arith.constant 0 : i32
    %c0_i32_63 = arith.constant 0 : i32
    %46 = tpu.memref_slice %arg8[%0, %c0_i32_61, %c0_i32_62, %c0_i32_63] : memref<2x8x8x384xf32, #tpu.memory_space<vmem>> -> memref<1x8x8x384xf32, #tpu.memory_space<vmem>>
    %47 = tpu.memref_squeeze %46 : memref<1x8x8x384xf32, #tpu.memory_space<vmem>> -> memref<8x8x384xf32, #tpu.memory_space<vmem>>
    %c2_64 = arith.constant 2 : index
    %c0_65 = arith.constant 0 : index
    %c36 = arith.constant 36 : index
    %48 = vector.load %47[%c2_64, %c0_65, %c36] : memref<8x8x384xf32, #tpu.memory_space<vmem>>, vector<4x8x324xf32>
    %c0_66 = arith.constant 0 : index
    %c48 = arith.constant 48 : index
    %c0_67 = arith.constant 0 : index
    %49 = vector.load %arg9[%c0_66, %c48, %c0_67] : memref<4x72x324xf32, #tpu.memory_space<vmem>>, vector<4x8x324xf32>
    tpu.vector_store %arg9[%c0_66, %c48, %c0_67], %48 {strides = array<i32>} : memref<4x72x324xf32, #tpu.memory_space<vmem>>, vector<4x8x324xf32>,
    %c0_i32_68 = arith.constant 0 : i32
    %c0_i32_69 = arith.constant 0 : i32
    %c0_i32_70 = arith.constant 0 : i32
    %50 = tpu.memref_slice %arg8[%0, %c0_i32_68, %c0_i32_69, %c0_i32_70] : memref<2x8x8x384xf32, #tpu.memory_space<vmem>> -> memref<1x8x8x384xf32, #tpu.memory_space<vmem>>
    %51 = tpu.memref_squeeze %50 : memref<1x8x8x384xf32, #tpu.memory_space<vmem>> -> memref<8x8x384xf32, #tpu.memory_space<vmem>>
    %c2_71 = arith.constant 2 : index
    %c0_72 = arith.constant 0 : index
    %c37 = arith.constant 37 : index
    %52 = vector.load %51[%c2_71, %c0_72, %c37] : memref<8x8x384xf32, #tpu.memory_space<vmem>>, vector<4x8x324xf32>
    %c0_73 = arith.constant 0 : index
    %c56 = arith.constant 56 : index
    %c0_74 = arith.constant 0 : index
    %53 = vector.load %arg9[%c0_73, %c56, %c0_74] : memref<4x72x324xf32, #tpu.memory_space<vmem>>, vector<4x8x324xf32>
    tpu.vector_store %arg9[%c0_73, %c56, %c0_74], %52 {strides = array<i32>} : memref<4x72x324xf32, #tpu.memory_space<vmem>>, vector<4x8x324xf32>,
    %c0_i32_75 = arith.constant 0 : i32
    %c0_i32_76 = arith.constant 0 : i32
    %c0_i32_77 = arith.constant 0 : i32
    %54 = tpu.memref_slice %arg8[%0, %c0_i32_75, %c0_i32_76, %c0_i32_77] : memref<2x8x8x384xf32, #tpu.memory_space<vmem>> -> memref<1x8x8x384xf32, #tpu.memory_space<vmem>>
    %55 = tpu.memref_squeeze %54 : memref<1x8x8x384xf32, #tpu.memory_space<vmem>> -> memref<8x8x384xf32, #tpu.memory_space<vmem>>
    %c2_78 = arith.constant 2 : index
    %c0_79 = arith.constant 0 : index
    %c38 = arith.constant 38 : index
    %56 = vector.load %55[%c2_78, %c0_79, %c38] : memref<8x8x384xf32, #tpu.memory_space<vmem>>, vector<4x8x324xf32>
    %c0_80 = arith.constant 0 : index
    %c64 = arith.constant 64 : index
    %c0_81 = arith.constant 0 : index
    %57 = vector.load %arg9[%c0_80, %c64, %c0_81] : memref<4x72x324xf32, #tpu.memory_space<vmem>>, vector<4x8x324xf32>
    tpu.vector_store %arg9[%c0_80, %c64, %c0_81], %56 {strides = array<i32>} : memref<4x72x324xf32, #tpu.memory_space<vmem>>, vector<4x8x324xf32>,
    %c0_82 = arith.constant 0 : index
    %c0_83 = arith.constant 0 : index
    %c0_84 = arith.constant 0 : index
    %58 = vector.load %arg9[%c0_82, %c0_83, %c0_84] : memref<4x72x324xf32, #tpu.memory_space<vmem>>, vector<1x72x324xf32>
    %59 = vector.shape_cast %58 : vector<1x72x324xf32> to vector<72x324xf32>
    %cst = arith.constant dense<0.000000e+00> : vector<8x324xf32>
    %60 = tpu.matmul %18, %59, %cst {dimension_numbers = #tpu.dot_dimension_numbers<[1], [0], [0], [1], [0, 0, 1, 1], [], []>} : vector<8x72xf32>, vector<72x324xf32>, vector<8x324xf32> -> vector<8x324xf32>
    %61 = vector.broadcast %20 : vector<8x1xf32> to vector<8x324xf32>
    %62 = arith.addf %60, %61 : vector<8x324xf32>
    %cst_85 = arith.constant 0.000000e+00 : f32
    %63 = vector.broadcast %cst_85 : f32 to vector<8x324xf32>
    %64 = arith.maximumf %62, %63 : vector<8x324xf32>
    %c0_i32_86 = arith.constant 0 : i32
    %c0_i32_87 = arith.constant 0 : i32
    %c0_i32_88 = arith.constant 0 : i32
    %65 = tpu.memref_slice %arg8[%0, %c0_i32_86, %c0_i32_87, %c0_i32_88] : memref<2x8x8x384xf32, #tpu.memory_space<vmem>> -> memref<1x8x8x384xf32, #tpu.memory_space<vmem>>
    %66 = tpu.memref_squeeze %65 : memref<1x8x8x384xf32, #tpu.memory_space<vmem>> -> memref<8x8x384xf32, #tpu.memory_space<vmem>>
    %c0_89 = arith.constant 0 : index
    %c0_90 = arith.constant 0 : index
    %c0_91 = arith.constant 0 : index
    %67 = vector.load %66[%c0_89, %c0_90, %c0_91] : memref<8x8x384xf32, #tpu.memory_space<vmem>>, vector<5x8x384xf32>
    %68 = vector.shape_cast %67 : vector<5x8x384xf32> to vector<40x384xf32>
    %69 = vector.extract_strided_slice %68 {offsets = [0, 19], sizes = [40, 324], strides = [1, 1]} : vector<40x384xf32> to vector<40x324xf32>
    %cst_92 = arith.constant dense<0.000000e+00> : vector<8x324xf32>
    %70 = tpu.matmul %19, %69, %cst_92 {dimension_numbers = #tpu.dot_dimension_numbers<[1], [0], [0], [1], [0, 0, 1, 1], [], []>} : vector<8x40xf32>, vector<40x324xf32>, vector<8x324xf32> -> vector<8x324xf32>
    %71 = vector.broadcast %21 : vector<8x1xf32> to vector<8x324xf32>
    %72 = arith.addf %70, %71 : vector<8x324xf32>
    %73 = arith.addf %64, %72 : vector<8x324xf32>
    %c0_93 = arith.constant 0 : index
    %c0_94 = arith.constant 0 : index
    %c0_95 = arith.constant 0 : index
    %c0_96 = arith.constant 0 : index
    %74 = vector.load %arg7[%c0_93, %c0_94, %c0_95, %c0_96] : memref<1x4x8x324xf32, #tpu.memory_space<vmem>>, vector<1x1x8x324xf32>
    %75 = vector.shape_cast %74 : vector<1x1x8x324xf32> to vector<8x324xf32>
    %76 = vector.shape_cast %73 : vector<8x324xf32> to vector<1x1x8x324xf32>
    tpu.vector_store %arg7[%c0_93, %c0_94, %c0_95, %c0_96], %76 {strides = array<i32>} : memref<1x4x8x324xf32, #tpu.memory_space<vmem>>, vector<1x1x8x324xf32>,
    %c1_97 = arith.constant 1 : index
    %c0_98 = arith.constant 0 : index
    %c0_99 = arith.constant 0 : index
    %77 = vector.load %arg9[%c1_97, %c0_98, %c0_99] : memref<4x72x324xf32, #tpu.memory_space<vmem>>, vector<1x72x324xf32>
    %78 = vector.shape_cast %77 : vector<1x72x324xf32> to vector<72x324xf32>
    %cst_100 = arith.constant dense<0.000000e+00> : vector<8x324xf32>
    %79 = tpu.matmul %18, %78, %cst_100 {dimension_numbers = #tpu.dot_dimension_numbers<[1], [0], [0], [1], [0, 0, 1, 1], [], []>} : vector<8x72xf32>, vector<72x324xf32>, vector<8x324xf32> -> vector<8x324xf32>
    %80 = vector.broadcast %20 : vector<8x1xf32> to vector<8x324xf32>
    %81 = arith.addf %79, %80 : vector<8x324xf32>
    %cst_101 = arith.constant 0.000000e+00 : f32
    %82 = vector.broadcast %cst_101 : f32 to vector<8x324xf32>
    %83 = arith.maximumf %81, %82 : vector<8x324xf32>
    %c0_i32_102 = arith.constant 0 : i32
    %c0_i32_103 = arith.constant 0 : i32
    %c0_i32_104 = arith.constant 0 : i32
    %84 = tpu.memref_slice %arg8[%0, %c0_i32_102, %c0_i32_103, %c0_i32_104] : memref<2x8x8x384xf32, #tpu.memory_space<vmem>> -> memref<1x8x8x384xf32, #tpu.memory_space<vmem>>
    %85 = tpu.memref_squeeze %84 : memref<1x8x8x384xf32, #tpu.memory_space<vmem>> -> memref<8x8x384xf32, #tpu.memory_space<vmem>>
    %c1_105 = arith.constant 1 : index
    %c0_106 = arith.constant 0 : index
    %c0_107 = arith.constant 0 : index
    %86 = vector.load %85[%c1_105, %c0_106, %c0_107] : memref<8x8x384xf32, #tpu.memory_space<vmem>>, vector<5x8x384xf32>
    %87 = vector.shape_cast %86 : vector<5x8x384xf32> to vector<40x384xf32>
    %88 = vector.extract_strided_slice %87 {offsets = [0, 19], sizes = [40, 324], strides = [1, 1]} : vector<40x384xf32> to vector<40x324xf32>
    %cst_108 = arith.constant dense<0.000000e+00> : vector<8x324xf32>
    %89 = tpu.matmul %19, %88, %cst_108 {dimension_numbers = #tpu.dot_dimension_numbers<[1], [0], [0], [1], [0, 0, 1, 1], [], []>} : vector<8x40xf32>, vector<40x324xf32>, vector<8x324xf32> -> vector<8x324xf32>
    %90 = vector.broadcast %21 : vector<8x1xf32> to vector<8x324xf32>
    %91 = arith.addf %89, %90 : vector<8x324xf32>
    %92 = arith.addf %83, %91 : vector<8x324xf32>
    %c0_109 = arith.constant 0 : index
    %c1_110 = arith.constant 1 : index
    %c0_111 = arith.constant 0 : index
    %c0_112 = arith.constant 0 : index
    %93 = vector.load %arg7[%c0_109, %c1_110, %c0_111, %c0_112] : memref<1x4x8x324xf32, #tpu.memory_space<vmem>>, vector<1x1x8x324xf32>
    %94 = vector.shape_cast %93 : vector<1x1x8x324xf32> to vector<8x324xf32>
    %95 = vector.shape_cast %92 : vector<8x324xf32> to vector<1x1x8x324xf32>
    tpu.vector_store %arg7[%c0_109, %c1_110, %c0_111, %c0_112], %95 {strides = array<i32>} : memref<1x4x8x324xf32, #tpu.memory_space<vmem>>, vector<1x1x8x324xf32>,
    %c2_113 = arith.constant 2 : index
    %c0_114 = arith.constant 0 : index
    %c0_115 = arith.constant 0 : index
    %96 = vector.load %arg9[%c2_113, %c0_114, %c0_115] : memref<4x72x324xf32, #tpu.memory_space<vmem>>, vector<1x72x324xf32>
    %97 = vector.shape_cast %96 : vector<1x72x324xf32> to vector<72x324xf32>
    %cst_116 = arith.constant dense<0.000000e+00> : vector<8x324xf32>
    %98 = tpu.matmul %18, %97, %cst_116 {dimension_numbers = #tpu.dot_dimension_numbers<[1], [0], [0], [1], [0, 0, 1, 1], [], []>} : vector<8x72xf32>, vector<72x324xf32>, vector<8x324xf32> -> vector<8x324xf32>
    %99 = vector.broadcast %20 : vector<8x1xf32> to vector<8x324xf32>
    %100 = arith.addf %98, %99 : vector<8x324xf32>
    %cst_117 = arith.constant 0.000000e+00 : f32
    %101 = vector.broadcast %cst_117 : f32 to vector<8x324xf32>
    %102 = arith.maximumf %100, %101 : vector<8x324xf32>
    %c0_i32_118 = arith.constant 0 : i32
    %c0_i32_119 = arith.constant 0 : i32
    %c0_i32_120 = arith.constant 0 : i32
    %103 = tpu.memref_slice %arg8[%0, %c0_i32_118, %c0_i32_119, %c0_i32_120] : memref<2x8x8x384xf32, #tpu.memory_space<vmem>> -> memref<1x8x8x384xf32, #tpu.memory_space<vmem>>
    %104 = tpu.memref_squeeze %103 : memref<1x8x8x384xf32, #tpu.memory_space<vmem>> -> memref<8x8x384xf32, #tpu.memory_space<vmem>>
    %c2_121 = arith.constant 2 : index
    %c0_122 = arith.constant 0 : index
    %c0_123 = arith.constant 0 : index
    %105 = vector.load %104[%c2_121, %c0_122, %c0_123] : memref<8x8x384xf32, #tpu.memory_space<vmem>>, vector<5x8x384xf32>
    %106 = vector.shape_cast %105 : vector<5x8x384xf32> to vector<40x384xf32>
    %107 = vector.extract_strided_slice %106 {offsets = [0, 19], sizes = [40, 324], strides = [1, 1]} : vector<40x384xf32> to vector<40x324xf32>
    %cst_124 = arith.constant dense<0.000000e+00> : vector<8x324xf32>
    %108 = tpu.matmul %19, %107, %cst_124 {dimension_numbers = #tpu.dot_dimension_numbers<[1], [0], [0], [1], [0, 0, 1, 1], [], []>} : vector<8x40xf32>, vector<40x324xf32>, vector<8x324xf32> -> vector<8x324xf32>
    %109 = vector.broadcast %21 : vector<8x1xf32> to vector<8x324xf32>
    %110 = arith.addf %108, %109 : vector<8x324xf32>
    %111 = arith.addf %102, %110 : vector<8x324xf32>
    %c0_125 = arith.constant 0 : index
    %c2_126 = arith.constant 2 : index
    %c0_127 = arith.constant 0 : index
    %c0_128 = arith.constant 0 : index
    %112 = vector.load %arg7[%c0_125, %c2_126, %c0_127, %c0_128] : memref<1x4x8x324xf32, #tpu.memory_space<vmem>>, vector<1x1x8x324xf32>
    %113 = vector.shape_cast %112 : vector<1x1x8x324xf32> to vector<8x324xf32>
    %114 = vector.shape_cast %111 : vector<8x324xf32> to vector<1x1x8x324xf32>
    tpu.vector_store %arg7[%c0_125, %c2_126, %c0_127, %c0_128], %114 {strides = array<i32>} : memref<1x4x8x324xf32, #tpu.memory_space<vmem>>, vector<1x1x8x324xf32>,
    %c3 = arith.constant 3 : index
    %c0_129 = arith.constant 0 : index
    %c0_130 = arith.constant 0 : index
    %115 = vector.load %arg9[%c3, %c0_129, %c0_130] : memref<4x72x324xf32, #tpu.memory_space<vmem>>, vector<1x72x324xf32>
    %116 = vector.shape_cast %115 : vector<1x72x324xf32> to vector<72x324xf32>
    %cst_131 = arith.constant dense<0.000000e+00> : vector<8x324xf32>
    %117 = tpu.matmul %18, %116, %cst_131 {dimension_numbers = #tpu.dot_dimension_numbers<[1], [0], [0], [1], [0, 0, 1, 1], [], []>} : vector<8x72xf32>, vector<72x324xf32>, vector<8x324xf32> -> vector<8x324xf32>
    %118 = vector.broadcast %20 : vector<8x1xf32> to vector<8x324xf32>
    %119 = arith.addf %117, %118 : vector<8x324xf32>
    %cst_132 = arith.constant 0.000000e+00 : f32
    %120 = vector.broadcast %cst_132 : f32 to vector<8x324xf32>
    %121 = arith.maximumf %119, %120 : vector<8x324xf32>
    %c0_i32_133 = arith.constant 0 : i32
    %c0_i32_134 = arith.constant 0 : i32
    %c0_i32_135 = arith.constant 0 : i32
    %122 = tpu.memref_slice %arg8[%0, %c0_i32_133, %c0_i32_134, %c0_i32_135] : memref<2x8x8x384xf32, #tpu.memory_space<vmem>> -> memref<1x8x8x384xf32, #tpu.memory_space<vmem>>
    %123 = tpu.memref_squeeze %122 : memref<1x8x8x384xf32, #tpu.memory_space<vmem>> -> memref<8x8x384xf32, #tpu.memory_space<vmem>>
    %c3_136 = arith.constant 3 : index
    %c0_137 = arith.constant 0 : index
    %c0_138 = arith.constant 0 : index
    %124 = vector.load %123[%c3_136, %c0_137, %c0_138] : memref<8x8x384xf32, #tpu.memory_space<vmem>>, vector<5x8x384xf32>
    %125 = vector.shape_cast %124 : vector<5x8x384xf32> to vector<40x384xf32>
    %126 = vector.extract_strided_slice %125 {offsets = [0, 19], sizes = [40, 324], strides = [1, 1]} : vector<40x384xf32> to vector<40x324xf32>
    %cst_139 = arith.constant dense<0.000000e+00> : vector<8x324xf32>
    %127 = tpu.matmul %19, %126, %cst_139 {dimension_numbers = #tpu.dot_dimension_numbers<[1], [0], [0], [1], [0, 0, 1, 1], [], []>} : vector<8x40xf32>, vector<40x324xf32>, vector<8x324xf32> -> vector<8x324xf32>
    %128 = vector.broadcast %21 : vector<8x1xf32> to vector<8x324xf32>
    %129 = arith.addf %127, %128 : vector<8x324xf32>
    %130 = arith.addf %121, %129 : vector<8x324xf32>
    %c0_140 = arith.constant 0 : index
    %c3_141 = arith.constant 3 : index
    %c0_142 = arith.constant 0 : index
    %c0_143 = arith.constant 0 : index
    %131 = vector.load %arg7[%c0_140, %c3_141, %c0_142, %c0_143] : memref<1x4x8x324xf32, #tpu.memory_space<vmem>>, vector<1x1x8x324xf32>
    %132 = vector.shape_cast %131 : vector<1x1x8x324xf32> to vector<8x324xf32>
    %133 = vector.shape_cast %130 : vector<8x324xf32> to vector<1x1x8x324xf32>
    tpu.vector_store %arg7[%c0_140, %c3_141, %c0_142, %c0_143], %133 {strides = array<i32>} : memref<1x4x8x324xf32, #tpu.memory_space<vmem>>, vector<1x1x8x324xf32>,
    return
  }
  func.func @transform_1(%arg0: i32, %arg1: i32) -> (i32, i32) {
    %c0_i32 = arith.constant 0 : i32
    %c0_i32_0 = arith.constant 0 : i32
    %c0_i32_1 = arith.constant 0 : i32
    return %c0_i32, %c0_i32_0 : i32, i32
  }
  func.func @transform_2(%arg0: i32, %arg1: i32) -> (i32, i32) {
    %c0_i32 = arith.constant 0 : i32
    %c0_i32_0 = arith.constant 0 : i32
    %c0_i32_1 = arith.constant 0 : i32
    return %c0_i32, %c0_i32_0 : i32, i32
  }
  func.func @transform_3(%arg0: i32, %arg1: i32) -> (i32, i32) {
    %c0_i32 = arith.constant 0 : i32
    %c0_i32_0 = arith.constant 0 : i32
    %c0_i32_1 = arith.constant 0 : i32
    return %c0_i32, %c0_i32_0 : i32, i32
  }
  func.func @transform_4(%arg0: i32, %arg1: i32) -> (i32, i32) {
    %c0_i32 = arith.constant 0 : i32
    %c0_i32_0 = arith.constant 0 : i32
    %c0_i32_1 = arith.constant 0 : i32
    return %c0_i32, %c0_i32_0 : i32, i32
  }
  func.func @transform_5(%arg0: i32, %arg1: i32) -> (i32, i32, i32, i32) {
    %c0_i32 = arith.constant 0 : i32
    %c0_i32_0 = arith.constant 0 : i32
    %c0_i32_1 = arith.constant 0 : i32
    return %arg0, %arg1, %c0_i32, %c0_i32_0 : i32, i32, i32, i32
  }
}

</mosaic_0001>

<bundles_post_ra>
// kernel: tpu_custom_call.1
= control target key start
LH: loop header
LB: loop body
LE: loop exit
PB: predicated region body
PF: predicated region fallthrough
CT: control target
= control target key end

     0   :  { %10 = vsyncpa [#allocation6], 0  ;;  %s4608_s0 = inlined_call_operand.hbm [shape: f32[2,12,8,384], index: 0, kind: input, shape index: {}]   ;;  %s4609_s1 = inlined_call_operand.vmem [shape: f32[8,72], index: 1, kind: input, shape index: {}]   ;;  %s4610_s2 = inlined_call_operand.vmem [shape: f32[8,40], index: 2, kind: input, shape index: {}]   ;;  %s4611_s3 = inlined_call_operand.vmem [shape: f32[8,1], index: 3, kind: input, shape index: {}]   ;;  %s4612_s4 = inlined_call_operand.vmem [shape: f32[8,1], index: 4, kind: input, shape index: {}]   ;;  %s4613_s5 = inlined_call_operand.hbm [shape: f32[2,8,8,324], index: 5, kind: output, shape index: {}]  }
   0x1   :  { %12 = vsyncpa [#allocation6 + $0x1], 0  ;;  %s3684_s18 = smov 0   ;;  %s3686_s19 = smov 0  }
   0x2   :  { %s3688_s20 = smov 0   ;;  %s3690_s21 = smov 0  }
   0x3   :  { %s3692_s22 = smov 0   ;;  %s3694_s23 = smov 0  }
   0x4   :  { %s3696_s24 = smov 0   ;;  %s3698_s25 = smov 0  }
   0x5 LB: > { %4624 = sst [smem:[#allocation15_spill]] %s3616_s20  ;;  %s2695_s26 = sadd.s32 4294967295, %s3636_s25   ;;  %s3636_s25 = sphi %s3698_s25, %s18_s25   ;;  %s3632_s24 = sphi %s3696_s24, %s4644_s24   ;;  %s3628_s23 = sphi %s3694_s23, %s4643_s23   ;;  %s3624_s22 = sphi %s3692_s22, %s4648_s22   ;;  %s3620_s21 = sphi %s3690_s21, %s4647_s21   ;;  %s3616_s20 = sphi %s3688_s20, %s4640_s20   ;;  %s3612_s19 = sphi %s3686_s19, %s4646_s19   ;;  %s3608_s18 = sphi %s3684_s18, %s4645_s18  }
   0x6   : > { %4625 = sst [smem:[#allocation16_spill]] %s3628_s23  ;;  %s2696_s27 = sadd.s32 4294967294, %s3636_s25  }
   0x7   : > { %4626 = sst [smem:[#allocation17_spill]] %s3632_s24  ;;  %s27_s28 = sadd.s32 1, %s3628_s23 }
   0x8   : > { %p28_p0 = scmp.ge.s32.totalorder %s27_s28, 2  ;;  %s30_s29 = sadd.s32 1, %s3632_s24 }
   0x9   : > { %p133_p1 = scmp.ne.s32.totalorder %s3616_s20, %s3612_s19  ;;  %p134_p2 = scmp.eq.s32.totalorder %s2695_s26, 3 }
   0xa   : > { %s4650_s28 = smov (%p28_p0, %s27_s28), 0  ;;  %s4652_s29 = smov (!%p28_p0, %s30_s29), %s3632_s24 }
   0xb   : > { %4627 = sst [smem:[#allocation18_spill]] %s4650_s28  ;;  %s119_s30 = ssub.s32 %s3628_s23, %s4650_s28 }
   0xc   : > { %p3735_p3 = por %p134_p2, %p133_p1  ;;  %p32_p4 = scmp.ge.s32.totalorder %s4652_s29, 2 }
   0xd   : > { %p139_p5 = scmp.ne.s32.totalorder %s3612_s19, %s3608_s18  ;;  %p140_p6 = scmp.eq.s32.totalorder %s2696_s27, 3 }
   0xe   : > { %s4628_s6 = scalar_select %p3735_p3, 1, 0 }
   0xf   : > { %p2698_p7 = scmp.ge.s32.totalorder %s3636_s25, 1  ;;  %s4654_s29 = smov (%p32_p4, %s4652_s29), 0 }
  0x10   : > { %4629 = sst [smem:[#allocation19_spill]] %s4654_s29  ;;  %p3744_p8 = por %p140_p6, %p139_p5 }
  0x11   : > { %p170_p9 = scmp.lt.s32.totalorder %s3636_s25, 5  ;;  %s118_s8 = ssub.s32 %s3632_s24, %s4654_s29 }
  0x12   : > { %s4630_s7 = scalar_select %p3744_p8, 1, 0 }
  0x13   : > { %s123_s9 = sadd.s32 1, %s3616_s20  ;;  %s120_s10 = sor.u32 %s119_s30, %s118_s8 }
  0x14   : > { %p171_p10 = pnand %p2698_p7, %p170_p9  ;;  %p121_p11 = scmp.eq.s32.totalorder %s120_s10, 0 }
  0x15   : > { %s4615_s12 = sand.u32 (!%p171_p10), 1, %s3612_s19   ;;  %p192_p12 = scmp.lt.s32.totalorder (!%p171_p10), %s3620_s21, 0 }
  0x16   : > { %s3753_s11 = scalar_select %p121_p11, %s3616_s20, %s123_s9  }
  0x17   : > { %174 = sbr.rel (%p171_p10) target bundleno = 698 (0x2ba), region = 36  ;;  %s193_s14 = ssub.s32 (!%p171_p10), 0, %s3620_s21 }
  0x18   : > { %4631 = sst [smem:[#allocation20_spill]] %s3753_s11  ;;  %s3759_s13 = smul.u32 (!%p171_p10), 96, %s4615_s12 }
  0x19   : > { %s2699_s15 = smin.u32 (!%p171_p10), %s3620_s21, %s193_s14  ;;  %s4618_s26 = smul.u32 (!%p171_p10), 12, %s3620_s21 }
  0x1a   : > { %s195_s16 = sand.u32 (!%p171_p10), 1, %s2699_s15   ;;  %s3765_s27 = sadd.s32 (!%p171_p10), 1, %s3620_s21 }
  0x1b   : > { %s196_s17 = ssub.s32 (!%p171_p10), 0, %s195_s16  ;;  %p3279_p13 = scmp.eq.s32.totalorder (!%p171_p10), %s3620_s21, 0 }
  0x1c   : > { %s211_s30 = smul.u32 (!%p171_p10), 36, %s3624_s22  ;;  %p199_p0 = scmp.lt.s32.totalorder (!%p171_p10), %s3765_s27, 0 }
  0x1d   : > { %s4620_s12 = scalar_lea.hbm (!%p171_p10), %s4608_s0, 9216 }
  0x1e   : > { %s4656_s17 = smov (!%p192_p12, %s196_s17), %s195_s16  ;;  %s212_s9 = sadd.s32 %s4618_s26, %s211_s30 }
  0x1f   : > { %s2895_s8 = smul.u32 192, %s4656_s17  ;;  %s2704_s29 = sshll.u32 %s212_s9, 7 }
  0x20   : > { %s3775_s14 = scalar_lea.hbm %s4608_s0, %s2704_s29  ;;  %s3783_s24 = scalar_lea.sflag [#allocation4], %s4656_s17 }
  0x21   : > { %s3777_s15 = scalar_lea.vmem [#allocation2], %s2895_s8  ;;  %s3483_s30 = scalar_lea.hbm %s3775_s14, 3072 }
  0x22   : > { %s226_s16 = sshll.u32 %s3777_s15, 4  ;;  %p3484_p1 = scmp.ne.s32.totalorder %s3775_s14, %s3483_s30  ;;  %s3780_s16 = int_to_ptr.vmem [resolvable:$true] %s226_s16 }
  0x23   : > { %p3488_p5 = scmp.lt.u32.totalorder %s3775_s14, %s4608_s0  ;;  %p3489_p6 = scmp.lt.u32.totalorder %s4620_s12, %s3483_s30 }
  0x24   : > { %p3485_p2 = pnand %p3484_p1, %p3279_p13  ;;  %p3491_p9 = scmp.lt.u32.totalorder %s3483_s30, %s3775_s14 }
  0x25   : > { %p3490_p7 = por %p3489_p6, %p3488_p5 }
  0x26   : > { %p3486_p4 = pneg %p3485_p2 }
  0x27   : > { %p3492_p10 = por %p3491_p9, %p3490_p7 }
  0x29   : > { %p3493_p11 = pnand %p3492_p10, %p3486_p4 }
  0x2b   : > { %3496 = shalt.err (!%p3493_p11)  }
  0x2c   : > { %s3497_s17 = scalar_lea.vmem %s3780_s16, 3072  ;;  %s3638_s26 = smov [#allocation2]  }
  0x2d   : > { %p3498_p12 = scmp.ne.s32.totalorder %s3780_s16, %s3497_s17  ;;  %s3501_s28 = sshll.u32 %s3638_s26, 4  ;;  %s3805_s28 = int_to_ptr.vmem [resolvable:$false] %s3501_s28 }
  0x2e   : > { %s4619_s10 = scalar_lea.vmem %s3805_s28, 6144  ;;  %p3504_p5 = scmp.lt.s32.totalorder %s3780_s16, %s3805_s28 }
  0x2f   : > { %p3499_p1 = pnand %p3498_p12, %p3279_p13  ;;  %p3505_p4 = scmp.lt.s32.totalorder %s4619_s10, %s3497_s17 }
  0x31   : > { %p3500_p2 = pneg %p3499_p1  ;;  %p3506_p6 = por %p3505_p4, %p3504_p5 }
  0x33   : > { %p3507_p7 = pnand %p3506_p6, %p3500_p2 }
  0x35   : > { %3510 = shalt.err (!%p3507_p7)  }
  0x36   : > { %3270 = dma.hbm_to_vmem [thread:$0]  (%p3279_p13), %s3775_s14, 3072, %s3780_s16, %s3783_s24 }
  0x37   : > { %s4632_s30 = ssub.s32 0, %s3765_s27  ;;  %s2651_s26 = scalar_lea.hbm %s3775_s14, 1536 }
  0x38   : > { %s2700_s29 = smin.u32 %s4632_s30, %s3765_s27  ;;  %p3280_p9 = scmp.lt.s32.totalorder %s3765_s27, 2 }
  0x39   : > { %s202_s9 = sand.u32 1, %s2700_s29   ;;  %s3539_s11 = scalar_lea.hbm %s3775_s14, 4608 }
  0x3a   : > { %s203_s8 = ssub.s32 0, %s202_s9  ;;  %p3512_p10 = scmp.ne.s32.totalorder %s2651_s26, %s3539_s11 }
  0x3b   : > { %s4658_s8 = smov (!%p199_p0, %s203_s8), %s202_s9  ;;  %p3516_p12 = scmp.lt.u32.totalorder %s2651_s26, %s4608_s0 }
  0x3c   : > { %s2896_s17 = smul.u32 192, %s4658_s8  ;;  %s243_s23 = scalar_lea.sflag [#allocation4], %s4658_s8 }
  0x3d   : > { %p3513_p13 = pnand %p3512_p10, %p3280_p9  ;;  %s4633_s20 = scalar_lea.hbm %s4608_s0, 9216 }
  0x3e   : > { %s242_s10 = scalar_lea.vmem [#allocation2], %s2896_s17  ;;  %p3517_p0 = scmp.lt.u32.totalorder %s4633_s20, %s3539_s11 }
  0x3f   : > { %s251_s12 = sshll.u32 %s242_s10, 4  ;;  %p3514_p11 = pneg %p3513_p13  ;;  %s252_s12 = int_to_ptr.vmem [resolvable:$true] %s251_s12 }
  0x40   : > { %p3518_p1 = por %p3517_p0, %p3516_p12  ;;  %p3519_p2 = scmp.lt.u32.totalorder %s3539_s11, %s2651_s26 }
  0x42   : > { %p3520_p5 = por %p3519_p2, %p3518_p1 }
  0x44   : > { %p3521_p4 = pnand %p3520_p5, %p3514_p11 }
  0x46   : > { %3524 = shalt.err (!%p3521_p4)  }
  0x47   : > { %s3525_s10 = scalar_lea.vmem %s252_s12, 3072  ;;  %p3532_p13 = scmp.lt.s32.totalorder %s252_s12, %s3805_s28 }
  0x48   : > { %p3526_p6 = scmp.ne.s32.totalorder %s252_s12, %s3525_s10  ;;  %s4634_s14 = scalar_lea.vmem %s3805_s28, 6144 }
  0x49   : > { %p3533_p8 = scmp.lt.s32.totalorder %s4634_s14, %s3525_s10 }
  0x4a   : > { %p3527_p7 = pnand %p3526_p6, %p3280_p9 }
  0x4b   : > { %p3534_p3 = por %p3533_p8, %p3532_p13 }
  0x4c   : > { %p3528_p10 = pneg %p3527_p7 }
  0x4e   : > { %p3535_p0 = pnand %p3534_p3, %p3528_p10 }
  0x50   : > { %3538 = shalt.err (!%p3535_p0)  }
  0x51   : > { %3272 = dma.hbm_to_vmem [thread:$0]  (%p3280_p9), %s2651_s26, 3072, %s252_s12, %s243_s23 }
  0x52   : > { %s3846_s20 = scalar_lea.vmem [#allocation5], %s3759_s13 }
  0x53   : > { %3600 = dma.done.wait %s3783_s24, 3072 }
  0x54   : > { %3601 = vsyncadd %s3783_s24, 4294964224  ;;  %vm284_vm0 = vcmask 556032   ;;  %v3851_v0 = vld [vmem:[%s3777_s15 + $0x38] sm:$0xff]  ;;  %v3854_v1 = vld [vmem:[%s3777_s15 + $0x30] sm:$0xff]  ;;  %s3639_s11 = smov 127   ;;  %v3640_v3 = vmov 0.0|0.0  }
  0x55   : > { %v2724_v2 = vld [vmem:[%s3777_s15 + $0x40] sm:$0xff]  ;;  %321 = vrot.lane.b32.xlu0 %v3851_v0, %s3639_s11  ;;  %319 = vrot.lane.b32.xlu1 %v3854_v1, %s3639_s11  ;;  %v3864_v4 = vld [vmem:[%s3777_s15 + $0x50] sm:$0xff]  ;;  %s3641_s23 = smov 126   ;;  %s3642_s24 = smov 110   ;;  %v3647_v7 = vmov 0.0   ;;  %vm3649_vm1 = vmmov 0  }
  0x56   : > { %285 = vst.msk [vmem:[#allocation3 + $0x10] sm:$0xff] %vm284_vm0, %v2724_v2  ;;  %3114 = vmatprep.subr.bf16.mxu1 %v3640_v3  ;;  %v3867_v5 = vld [vmem:[%s3777_s15 + $0x58] sm:$0xff]  ;;  %v3870_v6 = vld [vmem:[%s3777_s15 + $0x48] sm:$0xff]  ;;  %s3643_s13 = smov 109   ;;  %s3644_s27 = smov 108   ;;  %1043 = vmatprep.mubr.f32.mxu0 %v3647_v7  ;;  %v1125_v9 = vld [vmem:[%s3777_s15 + $0x10] sm:$0xff]  ;;  %v3929_v17 = vpack.i.bf16 %v2724_v2, %v3851_v0 }
  0x57   : > { %288 = vst.msk [vmem:[#allocation3 + $0xe8] sm:$0xff] %vm284_vm0, %v3867_v5  ;;  %s3645_s12 = smov 92   ;;  %s3646_s28 = smov 91   ;;  %v1124_v8 = vld [vmem:[%s3777_s15 + $0x8] sm:$0xff]  ;;  %v1127_v10 = vld [vmem:[%s3777_s15 + $0x20] sm:$0xff]  ;;  %2980 = vmatprep.mubr.msk.f32.mxu1 %vm3649_vm1, %v3647_v7  ;;  %v1126_v15 = vld [vmem:[%s3777_s15 + $0x18] sm:$0xff]  ;;  %v3933_v18 = vpack.i.bf16 %v3867_v5, %v3864_v4  ;;  %v3941_v19 = vpack.i.bf16 %v3870_v6, %v3854_v1 }
  0x58   : > { %s3648_s8 = smov 90   ;;  %v1128_v11 = vld [vmem:[%s3777_s15 + $0x28] sm:$0xff]  ;;  %v3360_v12 = vpack.i.bf16 %v1125_v9, %v1124_v8  ;;  %v1123_v14 = vld [vmem:[%s3777_s15] sm:$0xff]  ;;  %v3971_v21 = vld [vmem:[%s3777_s15 + $0x70] sm:$0xff]  ;;  %vm343_vm2 = vcmask 1039360   ;;  %v3400_v25 = vpack.i.bf16 %v3854_v1, %v1126_v15  ;;  %vm424_vm3 = vcmask 1031168  }
  0x59   : > { %323 = vrot.lane.b32.xlu0 %v2724_v2, %s3639_s11  ;;  %402 = vrot.lane.b32.xlu1 %v3851_v0, %s3641_s23  ;;  %v3365_v13 = vpack.i.bf16 %v1128_v11, %v1127_v10  ;;  %v3370_v16 = vpack.i.bf16 %v1126_v15, %v1123_v14  ;;  %v3964_v20 = vld [vmem:[%s3777_s15 + $0x68] sm:$0xff]  ;;  %v3978_v22 = vld [vmem:[%s3777_s15 + $0x60] sm:$0xff]  ;;  %vm505_vm4 = vcmask 900096   ;;  %vm586_vm5 = vcmask 891904   ;;  %p4637_p8 = scmp.ne.s32.totalorder %s4628_s6, 0  ;;  %s3651_s16 = smov [#allocation5]  }
  0x5a   : > { %v4001_v23 = vld [vmem:[%s3777_s15 + $0x68] sm:$0xff]  ;;  %v4004_v24 = vld [vmem:[%s3777_s15 + $0x70] sm:$0xff]  ;;  %v4013_v26 = vld [vmem:[%s3777_s15 + $0x60] sm:$0xff]  ;;  %v4035_v38 = vpack.i.bf16 %v3971_v21, %v3964_v20  ;;  %v3415_v39 = vpack.i.bf16 %v3978_v22, %v3870_v6  ;;  %vm667_vm6 = vcmask 883712   ;;  %vm748_vm7 = vcmask 752640   ;;  %s3544_s30 = sshll.u32 %s3651_s16, 4  ;;  %s3545_s30 = int_to_ptr.vmem [resolvable:$false] %s3544_s30 }
  0x5b   : > { %291 = vst.msk [vmem:[#allocation3 + $0x1c0] sm:$0xff] %vm284_vm0, %v4004_v24  ;;  %vm829_vm8 = vcmask 744448   ;;  %v4080_v14 = vld [vmem:[%s3777_s15 + $0x88] sm:$0xff]  ;;  %vm910_vm9 = vcmask 736256   ;;  %vm975_vm10 = vcmask 588800   ;;  %vm1213_vm11 = vcmask 326656  }
  0x5c   : > { %s3546_s29 = scalar_lea.vmem %s3545_s30, 3072 }
  0x5d   : > { %404 = vrot.lane.b32.xlu0 %v2724_v2, %s3641_s23  ;;  %483 = vrot.lane.b32.xlu1 %v3851_v0, %s3642_s24  ;;  %v945_v40 = vld [vmem:[#allocation3 + $0x10] sm:$0xff] }
  0x61   : > { %485 = vrot.lane.b32.xlu0 %v2724_v2, %s3642_s24  ;;  %400 = vrot.lane.b32.xlu1 %v3854_v1, %s3641_s23 }
  0x65   : > { %481 = vrot.lane.b32.xlu0 %v3854_v1, %s3642_s24  ;;  %564 = vrot.lane.b32.xlu1 %v3851_v0, %s3643_s13 }
  0x69   : > { %566 = vrot.lane.b32.xlu0 %v2724_v2, %s3643_s13  ;;  %645 = vrot.lane.b32.xlu1 %v3851_v0, %s3644_s27 }
  0x6d   : > { %647 = vrot.lane.b32.xlu0 %v2724_v2, %s3644_s27  ;;  %562 = vrot.lane.b32.xlu1 %v3854_v1, %s3643_s13 }
  0x71   : > { %643 = vrot.lane.b32.xlu0 %v3854_v1, %s3644_s27  ;;  %726 = vrot.lane.b32.xlu1 %v3851_v0, %s3645_s12 }
  0x75   : > { %728 = vrot.lane.b32.xlu0 %v2724_v2, %s3645_s12  ;;  %807 = vrot.lane.b32.xlu1 %v3851_v0, %s3646_s28 }
  0x79   : > { %809 = vrot.lane.b32.xlu0 %v2724_v2, %s3646_s28  ;;  %724 = vrot.lane.b32.xlu1 %v3854_v1, %s3645_s12 }
  0x7d   : > { %805 = vrot.lane.b32.xlu0 %v3854_v1, %s3646_s28  ;;  %888 = vrot.lane.b32.xlu1 %v3851_v0, %s3648_s8 }
  0x81   : > { %890 = vrot.lane.b32.xlu0 %v2724_v2, %s3648_s8  ;;  %886 = vrot.lane.b32.xlu1 %v3854_v1, %s3648_s8 }
  0x85   : > { %3361 = vrot.lane.b32.xlu0 %v3360_v12, %s3643_s13  ;;  %3366 = vrot.lane.b32.xlu1 %v3365_v13, %s3643_s13 }
  0x89   : > { %3371 = vrot.lane.b32.xlu0 %v3370_v16, %s3643_s13  ;;  %327 = vrot.lane.b32.xlu1 %v3864_v4, %s3639_s11 }
  0x8d   : > { %329 = vrot.lane.b32.xlu0 %v3867_v5, %s3639_s11  ;;  %325 = vrot.lane.b32.xlu1 %v3870_v6, %s3639_s11 }
  0x91   : > { %3376 = vrot.lane.b32.xlu0 %v3929_v17, %s3643_s13  ;;  %3381 = vrot.lane.b32.xlu1 %v3933_v18, %s3643_s13 }
  0x95   : > { %3386 = vrot.lane.b32.xlu0 %v3941_v19, %s3643_s13  ;;  %408 = vrot.lane.b32.xlu1 %v3864_v4, %s3641_s23 }
  0x99   : > { %410 = vrot.lane.b32.xlu0 %v3867_v5, %s3641_s23  ;;  %489 = vrot.lane.b32.xlu1 %v3864_v4, %s3642_s24 }
  0x9d   : > { %491 = vrot.lane.b32.xlu0 %v3867_v5, %s3642_s24  ;;  %406 = vrot.lane.b32.xlu1 %v3870_v6, %s3641_s23 }
  0xa1   : > { %487 = vrot.lane.b32.xlu0 %v3870_v6, %s3642_s24  ;;  %570 = vrot.lane.b32.xlu1 %v3864_v4, %s3643_s13 }
  0xa5   : > { %572 = vrot.lane.b32.xlu0 %v3867_v5, %s3643_s13  ;;  %651 = vrot.lane.b32.xlu1 %v3864_v4, %s3644_s27 }
  0xa9   : > { %653 = vrot.lane.b32.xlu0 %v3867_v5, %s3644_s27  ;;  %1184 = vrot.lane.b32.xlu1 %v3964_v20, %s3643_s13 }
  0xad   : > { %1186 = vrot.lane.b32.xlu0 %v3971_v21, %s3643_s13  ;;  %568 = vrot.lane.b32.xlu1 %v3870_v6, %s3643_s13 }
  0xb1   : > { %649 = vrot.lane.b32.xlu0 %v3870_v6, %s3644_s27  ;;  %1182 = vrot.lane.b32.xlu1 %v3978_v22, %s3643_s13 }
  0xb5   : > { %732 = vrot.lane.b32.xlu0 %v3864_v4, %s3645_s12  ;;  %734 = vrot.lane.b32.xlu1 %v3867_v5, %s3645_s12 }
  0xb9   : > { %813 = vrot.lane.b32.xlu0 %v3864_v4, %s3646_s28  ;;  %815 = vrot.lane.b32.xlu1 %v3867_v5, %s3646_s28 }
  0xbd   : > { %730 = vrot.lane.b32.xlu0 %v3870_v6, %s3645_s12  ;;  %811 = vrot.lane.b32.xlu1 %v3870_v6, %s3646_s28 }
  0xc1   : > { %894 = vrot.lane.b32.xlu0 %v3864_v4, %s3648_s8  ;;  %896 = vrot.lane.b32.xlu1 %v3867_v5, %s3648_s8 }
  0xc5   : > { %892 = vrot.lane.b32.xlu0 %v3870_v6, %s3648_s8  ;;  %3391 = vrot.lane.b32.xlu1 %v3365_v13, %s3643_s13  ;;  %v4077_v13 = vld [vmem:[%s3777_s15 + $0x80] sm:$0xff] }
  0xc7   : > { %v322_v27 = vpop.permute.xlu0 %321  ;;  %v320_v28 = vpop.permute.xlu1 %319 }
  0xc8   : > { %v344_v29 = vsel %vm343_vm2, %v320_v28, %v322_v27 }
  0xc9   : > { %3396 = vrot.lane.b32.xlu0 %v3929_v17, %s3643_s13  ;;  %3401 = vrot.lane.b32.xlu1 %v3400_v25, %s3643_s13  ;;  %v3100_v34 = vpack.c.bf16 %v344_v29, %v3854_v1 }
  0xcb   : > { %v324_v30 = vpop.permute.xlu0 %323  ;;  %v403_v31 = vpop.permute.xlu1 %402 }
  0xcc   : > { %v345_v32 = vsel %vm343_vm2, %v322_v27, %v324_v30  ;;  %366 = vst.msk [vmem:[#allocation3 + $0x28] sm:$0xff] %vm284_vm0, %v324_v30 }
  0xcd   : > { %333 = vrot.lane.b32.xlu0 %v3964_v20, %s3639_s11  ;;  %335 = vrot.lane.b32.xlu1 %v3971_v21, %s3639_s11  ;;  %v3098_v33 = vpack.c.bf16 %v345_v32, %v3851_v0 }
  0xcf   : > { %v405_v35 = vpop.permute.xlu0 %404  ;;  %v484_v36 = vpop.permute.xlu1 %483  ;;  %3099 = vmatprep.subr.bf16.mxu0 %v3098_v33  ;;  %v4096_v33 = vld [vmem:[%s3777_s15 + $0x78] sm:$0xff] }
  0xd0   : > { %v426_v37 = vsel %vm424_vm3, %v403_v31, %v405_v35  ;;  %447 = vst.msk [vmem:[#allocation3 + $0x40] sm:$0xff] %vm284_vm0, %v405_v35  ;;  %3101 = vmatpush1.bf16.msra.mxu0 %v3100_v34 }
  0xd1   : > { %331 = vrot.lane.b32.xlu0 %v3978_v22, %s3639_s11  ;;  %3406 = vrot.lane.b32.xlu1 %v3933_v18, %s3643_s13 }
  0xd3   : > { %v486_v41 = vpop.permute.xlu0 %485  ;;  %v401_v42 = vpop.permute.xlu1 %400  ;;  %v948_v43 = vld [vmem:[#allocation3 + $0x28] sm:$0xff] }
  0xd4   : > { %v507_v44 = vsel %vm505_vm4, %v484_v36, %v486_v41  ;;  %528 = vst.msk [vmem:[#allocation3 + $0x58] sm:$0xff] %vm284_vm0, %v486_v41  ;;  %v425_v45 = vsel %vm424_vm3, %v401_v42, %v403_v31  ;;  %v3115_v46 = vpack.c.bf16 %v948_v43, %v945_v40 }
  0xd5   : > { %3411 = vrot.lane.b32.xlu0 %v4035_v38, %s3643_s13  ;;  %3416 = vrot.lane.b32.xlu1 %v3415_v39, %s3643_s13  ;;  %v3102_v47 = vpack.c.bf16 %v507_v44, %v426_v37  ;;  %v4109_v44 = vld [vmem:[%s4609_s1] sm:$0xff] }
  0xd6   : > { %3116 = vmatpush3.bf16.msra.mxu1 %v3115_v46 }
  0xd7   : > { %v482_v48 = vpop.permute.xlu0 %481  ;;  %v565_v49 = vpop.permute.xlu1 %564  ;;  %3117 = vmatprep.subr.bf16.mxu1 %v3640_v3  ;;  %3103 = vmatprep.subr.bf16.mxu0 %v3102_v47  ;;  %v951_v54 = vld [vmem:[#allocation3 + $0x40] sm:$0xff] }
  0xd8   : > { %v506_v50 = vsel %vm505_vm4, %v482_v48, %v484_v36 }
  0xd9   : > { %414 = vrot.lane.b32.xlu0 %v3964_v20, %s3641_s23  ;;  %416 = vrot.lane.b32.xlu1 %v3971_v21, %s3641_s23  ;;  %v3104_v51 = vpack.c.bf16 %v506_v50, %v425_v45 }
  0xdb   : > { %v567_v52 = vpop.permute.xlu0 %566  ;;  %v646_v53 = vpop.permute.xlu1 %645  ;;  %v954_v55 = vld [vmem:[#allocation3 + $0x58] sm:$0xff]  ;;  %3105 = vmatpush1.bf16.msra.mxu0 %v3104_v51 }
  0xdc   : > { %v588_v56 = vsel %vm586_vm5, %v565_v49, %v567_v52  ;;  %609 = vst.msk [vmem:[#allocation3 + $0x70] sm:$0xff] %vm284_vm0, %v567_v52  ;;  %v3118_v57 = vpack.c.bf16 %v954_v55, %v951_v54 }
  0xdd   : > { %495 = vrot.lane.b32.xlu0 %v3964_v20, %s3642_s24  ;;  %497 = vrot.lane.b32.xlu1 %v3971_v21, %s3642_s24 }
  0xde   : > { %3119 = vmatpush3.bf16.msra.mxu1 %v3118_v57 }
  0xdf   : > { %v648_v58 = vpop.permute.xlu0 %647  ;;  %v563_v59 = vpop.permute.xlu1 %562  ;;  %3120 = vmatprep.subr.bf16.mxu1 %v3640_v3 }
  0xe0   : > { %v669_v60 = vsel %vm667_vm6, %v646_v53, %v648_v58  ;;  %690 = vst.msk [vmem:[#allocation3 + $0x88] sm:$0xff] %vm284_vm0, %v648_v58  ;;  %v587_v61 = vsel %vm586_vm5, %v563_v59, %v565_v49 }
  0xe1   : > { %412 = vrot.lane.b32.xlu0 %v3978_v22, %s3641_s23  ;;  %493 = vrot.lane.b32.xlu1 %v3978_v22, %s3642_s24  ;;  %v3106_v62 = vpack.c.bf16 %v669_v60, %v588_v56 }
  0xe3   : > { %v644_v63 = vpop.permute.xlu0 %643  ;;  %v727_v0 = vpop.permute.xlu1 %726  ;;  %3107 = vmatprep.subr.bf16.mxu0 %v3106_v62  ;;  %v957_v9 = vld [vmem:[#allocation3 + $0x70] sm:$0xff] }
  0xe4   : > { %v668_v1 = vsel %vm667_vm6, %v644_v63, %v646_v53 }
  0xe5   : > { %576 = vrot.lane.b32.xlu0 %v3964_v20, %s3643_s13  ;;  %578 = vrot.lane.b32.xlu1 %v3971_v21, %s3643_s13  ;;  %v3108_v2 = vpack.c.bf16 %v668_v1, %v587_v61 }
  0xe7   : > { %v729_v5 = vpop.permute.xlu0 %728  ;;  %v808_v8 = vpop.permute.xlu1 %807  ;;  %v960_v10 = vld [vmem:[#allocation3 + $0x88] sm:$0xff]  ;;  %3109 = vmatpush1.bf16.msra.mxu0 %v3108_v2 }
  0xe8   : > { %v750_v11 = vsel %vm748_vm7, %v727_v0, %v729_v5  ;;  %771 = vst.msk [vmem:[#allocation3 + $0xa0] sm:$0xff] %vm284_vm0, %v729_v5  ;;  %v3121_v12 = vpack.c.bf16 %v960_v10, %v957_v9 }
  0xe9   : > { %657 = vrot.lane.b32.xlu0 %v3964_v20, %s3644_s27  ;;  %659 = vrot.lane.b32.xlu1 %v3971_v21, %s3644_s27 }
  0xea   : > { %3122 = vmatpush3.bf16.msra.mxu1 %v3121_v12 }
  0xeb   : > { %v810_v15 = vpop.permute.xlu0 %809  ;;  %v725_v16 = vpop.permute.xlu1 %724  ;;  %3123 = vmatprep.subr.bf16.mxu1 %v3640_v3 }
  0xec   : > { %v831_v25 = vsel %vm829_vm8, %v808_v8, %v810_v15  ;;  %852 = vst.msk [vmem:[#allocation3 + $0xb8] sm:$0xff] %vm284_vm0, %v810_v15  ;;  %v749_v27 = vsel %vm748_vm7, %v725_v16, %v727_v0  ;;  %v4152_v16 = vld [vmem:[%s3777_s15 + $0x80] sm:$0xff] }
  0xed   : > { %1593 = vrot.lane.b32.xlu0 %v4077_v13, %s3643_s13  ;;  %1595 = vrot.lane.b32.xlu1 %v4080_v14, %s3643_s13  ;;  %v3110_v28 = vpack.c.bf16 %v831_v25, %v750_v11  ;;  %v2721_v11 = vld [vmem:[%s3777_s15 + $0x88] sm:$0xff]  ;;  %v4155_v25 = vld [vmem:[%s3777_s15 + $0x78] sm:$0xff] }
  0xee   : > { %294 = vst.msk [vmem:[#allocation3 + $0x298] sm:$0xff] %vm284_vm0, %v2721_v11 }
  0xef   : > { %v806_v29 = vpop.permute.xlu0 %805  ;;  %v889_v30 = vpop.permute.xlu1 %888  ;;  %3111 = vmatprep.subr.bf16.mxu0 %v3110_v28  ;;  %v963_v36 = vld [vmem:[#allocation3 + $0xa0] sm:$0xff] }
  0xf0   : > { %v830_v31 = vsel %vm829_vm8, %v806_v29, %v808_v8 }
  0xf1   : > { %574 = vrot.lane.b32.xlu0 %v3978_v22, %s3643_s13  ;;  %655 = vrot.lane.b32.xlu1 %v3978_v22, %s3644_s27  ;;  %v3112_v32 = vpack.c.bf16 %v830_v31, %v749_v27 }
  0xf3   : > { %v891_v34 = vpop.permute.xlu0 %890  ;;  %v887_v35 = vpop.permute.xlu1 %886  ;;  %v966_v37 = vld [vmem:[#allocation3 + $0xb8] sm:$0xff]  ;;  %3113 = vmatpush1.bf16.msra.mxu0 %v3112_v32 }
  0xf4   : > { %v912_v39 = vsel %vm910_vm9, %v889_v30, %v891_v34  ;;  %933 = vst.msk [vmem:[#allocation3 + $0xd0] sm:$0xff] %vm284_vm0, %v891_v34  ;;  %v911_v40 = vsel %vm910_vm9, %v887_v35, %v889_v30  ;;  %v3124_v41 = vpack.c.bf16 %v966_v37, %v963_v36 }
  0xf5   : > { %1591 = vrot.lane.b32.xlu0 %v4096_v33, %s3643_s13  ;;  %738 = vrot.lane.b32.xlu1 %v3964_v20, %s3645_s12 }
  0xf6   : > { %3125 = vmatpush3.bf16.msra.mxu1 %v3124_v41  ;;  %995 = vmatprep.subr.mxu0 %v912_v39 }
  0xf7   : > { %v3362_v42 = vpop.permute.xlu0 %3361  ;;  %v3367_v43 = vpop.permute.xlu1 %3366  ;;  %2978 = vmatprep.subr.mxu1 %v3647_v7  ;;  %996 = vmatpush1.msra.mxu0 %v911_v40 }
  0xf8   : > { %v3364_v45 = vunpack.i.h.bf16 %v3362_v42  ;;  %v3363_v46 = vunpack.i.l.bf16 %v3362_v42  ;;  %v3369_v47 = vunpack.i.h.bf16 %v3367_v43  ;;  %v3368_v48 = vunpack.i.l.bf16 %v3367_v43  ;;  %2818 = vmatmul.mubr.msk.f32.vlgmr.msra.gmra.mrb[0].mxu0 %vm975_vm10, %v4109_v44 }
  0xf9   : > { %740 = vrot.lane.b32.xlu0 %v3971_v21, %s3645_s12  ;;  %819 = vrot.lane.b32.xlu1 %v3964_v20, %s3646_s28 }
  0xfa   : > { %v1189_v49 = vsel %vm586_vm5, %v3363_v46, %v3364_v45  ;;  %v1191_v50 = vsel %vm586_vm5, %v3368_v48, %v3369_v47  ;;  %1281 = vmatprep.mubr.f32.mxu0 %v3647_v7  ;;  %v3135_v57 = vpack.c.bf16 %v3369_v47, %v3364_v45  ;;  %v3445_v45 = vpack.i.bf16 %v4096_v33, %v3978_v22 }
  0xfb   : > { %v3372_v51 = vpop.permute.xlu0 %3371  ;;  %v328_v52 = vpop.permute.xlu1 %327  ;;  %v969_v53 = vld [vmem:[#allocation3 + $0xd0] sm:$0xff]  ;;  %v3126_v54 = vpack.c.bf16 %v1191_v50, %v1189_v49 }
  0xfc   : > { %v3374_v55 = vunpack.i.h.bf16 %v3372_v51  ;;  %v3373_v56 = vunpack.i.l.bf16 %v3372_v51  ;;  %2979 = vmatpush3.msra.mxu1 %v969_v53 }
  0xfd   : > { %821 = vrot.lane.b32.xlu0 %v3971_v21, %s3646_s28  ;;  %736 = vrot.lane.b32.xlu1 %v3978_v22, %s3645_s12 }
  0xfe   : > { %v1188_v58 = vsel %vm586_vm5, %v3373_v56, %v3363_v46  ;;  %v1190_v59 = vsel %vm586_vm5, %v3374_v55, %v3368_v48  ;;  %3134 = vmatprep.subr.bf16.mxu1 %v3640_v3  ;;  %2981 = vmatmul.mubr.msk.f32.vlgmr.msra.gmra.mrb[0].mxu1 %vm975_vm10, %v4109_v44  ;;  %v4216_v56 = vld [vmem:[%s4610_s2] sm:$0xff] }
  0xff   : > { %3136 = vmatpush3.bf16.msra.mxu1 %v3135_v57  ;;  %v330_v60 = vpop.permute.xlu0 %329  ;;  %v326_v61 = vpop.permute.xlu1 %325  ;;  %3127 = vmatprep.subr.bf16.mxu0 %v3126_v54  ;;  %v3128_v62 = vpack.c.bf16 %v1190_v59, %v1188_v58 }
 0x100   : > { %v4130_v63 = vsel %vm343_vm2, %v328_v52, %v330_v60  ;;  %369 = vst.msk [vmem:[#allocation3 + $0x100] sm:$0xff] %vm284_vm0, %v330_v60  ;;  %v4134_v0 = vsel %vm343_vm2, %v326_v61, %v328_v52  ;;  %3137 = vmatprep.subr.bf16.mxu1 %v3640_v3  ;;  %2993 = vmatprep.mubr.msk.f32.mxu1 %vm3649_vm1, %v3647_v7  ;;  %v1367_v52 = vld [vmem:[#allocation3 + $0xe8] sm:$0xff] }
 0x101   : > { %817 = vrot.lane.b32.xlu0 %v3978_v22, %s3646_s28  ;;  %900 = vrot.lane.b32.xlu1 %v3964_v20, %s3648_s8 }
 0x102   : > { %3129 = vmatpush1.bf16.msra.mxu0 %v3128_v62 }
 0x103   : > { %v3377_v1 = vpop.permute.xlu0 %3376  ;;  %v3382_v2 = vpop.permute.xlu1 %3381 }
 0x104   : > { %v3379_v5 = vunpack.i.h.bf16 %v3377_v1  ;;  %v3378_v8 = vunpack.i.l.bf16 %v3377_v1  ;;  %v3384_v9 = vunpack.i.h.bf16 %v3382_v2  ;;  %v3383_v10 = vunpack.i.l.bf16 %v3382_v2 }
 0x105   : > { %902 = vrot.lane.b32.xlu0 %v3971_v21, %s3648_s8  ;;  %898 = vrot.lane.b32.xlu1 %v3978_v22, %s3648_s8  ;;  %v3140_v1 = vpack.c.bf16 %v4130_v63, %v3864_v4 }
 0x106   : > { %v3138_v12 = vpack.c.bf16 %v3384_v9, %v3379_v5  ;;  %v1193_v15 = vsel %vm586_vm5, %v3378_v8, %v3379_v5  ;;  %v1195_v20 = vsel %vm586_vm5, %v3383_v10, %v3384_v9 }
 0x107   : > { %v3387_v27 = vpop.permute.xlu0 %3386  ;;  %v409_v28 = vpop.permute.xlu1 %408  ;;  %v3130_v29 = vpack.c.bf16 %v1195_v20, %v1193_v15  ;;  %v1370_v53 = vld [vmem:[#allocation3 + $0x100] sm:$0xff] }
 0x108   : > { %v3389_v30 = vunpack.i.h.bf16 %v3387_v27  ;;  %v3388_v21 = vunpack.i.l.bf16 %v3387_v27  ;;  %3139 = vmatpush3.bf16.msra.mxu1 %v3138_v12  ;;  %v3157_v57 = vpack.c.bf16 %v1370_v53, %v1367_v52 }
 0x109   : > { %3421 = vrot.lane.b32.xlu0 %v3929_v17, %s3643_s13  ;;  %3426 = vrot.lane.b32.xlu1 %v3933_v18, %s3643_s13 }
 0x10a   : > { %v1192_v31 = vsel %vm586_vm5, %v3388_v21, %v3378_v8  ;;  %v1194_v32 = vsel %vm586_vm5, %v3389_v30, %v3383_v10  ;;  %3131 = vmatprep.subr.bf16.mxu0 %v3130_v29  ;;  %2991 = vmatprep.subr.mxu1 %v3647_v7  ;;  %v3142_v8 = vpack.c.bf16 %v4134_v0, %v3870_v6 }
 0x10b   : > { %v411_v34 = vpop.permute.xlu0 %410  ;;  %v490_v35 = vpop.permute.xlu1 %489  ;;  %v3132_v36 = vpack.c.bf16 %v1194_v32, %v1192_v31  ;;  %v4264_v31 = vld [vmem:[%s3777_s15 + $0xa0] sm:$0xff] }
 0x10c   : > { %v4165_v37 = vsel %vm424_vm3, %v409_v28, %v411_v34  ;;  %450 = vst.msk [vmem:[#allocation3 + $0x118] sm:$0xff] %vm284_vm0, %v411_v34 }
 0x10d   : > { %3431 = vrot.lane.b32.xlu0 %v3941_v19, %s3643_s13  ;;  %339 = vrot.lane.b32.xlu1 %v4077_v13, %s3639_s11  ;;  %v4185_v19 = vpack.i.bf16 %v4080_v14, %v4077_v13 }
 0x10e   : > { %3133 = vmatpush1.bf16.msra.mxu0 %v3132_v36 }
 0x10f   : > { %v492_v17 = vpop.permute.xlu0 %491  ;;  %v407_v18 = vpop.permute.xlu1 %406 }
 0x110   : > { %v4173_v39 = vsel %vm505_vm4, %v490_v35, %v492_v17  ;;  %531 = vst.msk [vmem:[#allocation3 + $0x130] sm:$0xff] %vm284_vm0, %v492_v17  ;;  %v4177_v40 = vsel %vm424_vm3, %v407_v18, %v409_v28  ;;  %v4253_v28 = vld [vmem:[%s3777_s15 + $0x98] sm:$0xff] }
 0x111   : > { %341 = vrot.lane.b32.xlu0 %v4080_v14, %s3639_s11  ;;  %337 = vrot.lane.b32.xlu1 %v4096_v33, %s3639_s11  ;;  %v3144_v11 = vpack.c.bf16 %v4173_v39, %v4165_v37 }
 0x113   : > { %v488_v41 = vpop.permute.xlu0 %487  ;;  %v571_v42 = vpop.permute.xlu1 %570  ;;  %v1373_v2 = vld [vmem:[#allocation3 + $0x118] sm:$0xff] }
 0x114   : > { %v4188_v43 = vsel %vm505_vm4, %v488_v41, %v490_v35 }
 0x115   : > { %3436 = vrot.lane.b32.xlu0 %v4035_v38, %s3643_s13  ;;  %3441 = vrot.lane.b32.xlu1 %v4185_v19, %s3643_s13  ;;  %v3146_v0 = vpack.c.bf16 %v4188_v43, %v4177_v40  ;;  %v4274_v40 = vld [vmem:[%s3777_s15 + $0x90] sm:$0xff] }
 0x117   : > { %v573_v46 = vpop.permute.xlu0 %572  ;;  %v652_v47 = vpop.permute.xlu1 %651  ;;  %v1376_v60 = vld [vmem:[#allocation3 + $0x130] sm:$0xff] }
 0x118   : > { %v4197_v48 = vsel %vm586_vm5, %v571_v42, %v573_v46  ;;  %612 = vst.msk [vmem:[#allocation3 + $0x148] sm:$0xff] %vm284_vm0, %v573_v46  ;;  %v3160_v5 = vpack.c.bf16 %v1376_v60, %v1373_v2 }
 0x119   : > { %3446 = vrot.lane.b32.xlu0 %v3445_v45, %s3643_s13  ;;  %420 = vrot.lane.b32.xlu1 %v4077_v13, %s3641_s23 }
 0x11b   : > { %v654_v49 = vpop.permute.xlu0 %653  ;;  %v1185_v38 = vpop.permute.xlu1 %1184 }
 0x11c   : > { %v671_v50 = vsel %vm667_vm6, %v652_v47, %v654_v49  ;;  %693 = vst.msk [vmem:[#allocation3 + $0x160] sm:$0xff] %vm284_vm0, %v654_v49 }
 0x11d   : > { %422 = vrot.lane.b32.xlu0 %v4080_v14, %s3641_s23  ;;  %501 = vrot.lane.b32.xlu1 %v4077_v13, %s3642_s24  ;;  %v3148_v27 = vpack.c.bf16 %v671_v50, %v4197_v48 }
 0x11f   : > { %v1187_v22 = vpop.permute.xlu0 %1186  ;;  %v569_v51 = vpop.permute.xlu1 %568  ;;  %v1379_v6 = vld [vmem:[#allocation3 + $0x148] sm:$0xff] }
 0x120   : > { %v4210_v54 = vsel %vm586_vm5, %v569_v51, %v571_v42  ;;  %2992 = vmatpush3.msra.mxu1 %v1187_v22  ;;  %v1197_v55 = vsel %vm586_vm5, %v1185_v38, %v1187_v22 }
 0x121   : > { %503 = vrot.lane.b32.xlu0 %v4080_v14, %s3642_s24  ;;  %418 = vrot.lane.b32.xlu1 %v4096_v33, %s3641_s23  ;;  %s3268_s23 = smul.u32 24, %s3624_s22 }
 0x122   : > { %1225 = vmatprep.subr.mxu0 %v1197_v55  ;;  %3156 = vmatprep.subr.bf16.mxu1 %v3640_v3 }
 0x123   : > { %2994 = vmatmul.mubr.msk.f32.vlgmr.msra.gmra.mrb[2].mxu1 %vm1213_vm11, %v4216_v56  ;;  %v650_v58 = vpop.permute.xlu0 %649  ;;  %v1183_v59 = vpop.permute.xlu1 %1182  ;;  %v1382_v12 = vld [vmem:[#allocation3 + $0x160] sm:$0xff] }
 0x124   : > { %3158 = vmatpush3.bf16.msra.mxu1 %v3157_v57  ;;  %v670_v61 = vsel %vm667_vm6, %v650_v58, %v652_v47  ;;  %v1196_v62 = vsel %vm586_vm5, %v1183_v59, %v1185_v38  ;;  %3014 = vmatprep.mubr.msk.f32.mxu1 %vm3649_vm1, %v3647_v7  ;;  %v3163_v63 = vpack.c.bf16 %v1382_v12, %v1379_v6 }
 0x125   : > { %499 = vrot.lane.b32.xlu0 %v4096_v33, %s3642_s24  ;;  %582 = vrot.lane.b32.xlu1 %v4077_v13, %s3643_s13  ;;  %v3150_v21 = vpack.c.bf16 %v670_v61, %v4210_v54  ;;  %s4635_s24 = smul.u32 12, %s3620_s21 }
 0x126   : > { %1226 = vmatpush1.msra.mxu0 %v1196_v62  ;;  %3159 = vmatprep.subr.bf16.mxu1 %v3640_v3 }
 0x127   : > { %3141 = vmatprep.subr.bf16.mxu0 %v3140_v1  ;;  %v733_v9 = vpop.permute.xlu0 %732  ;;  %v735_v10 = vpop.permute.xlu1 %734  ;;  %2820 = vmatmul.mubr.msk.f32.vlgmr.msra.gmra.mrb[2].mxu0 %vm1213_vm11, %v4216_v56 }
 0x128   : > { %3161 = vmatpush3.bf16.msra.mxu1 %v3160_v5  ;;  %v752_v4 = vsel %vm748_vm7, %v733_v9, %v735_v10  ;;  %774 = vst.msk [vmem:[#allocation3 + $0x178] sm:$0xff] %vm284_vm0, %v735_v10  ;;  %3143 = vmatpush1.bf16.msra.mxu0 %v3142_v8  ;;  %v2869_v10 = vld [vmem:[%s3777_s15 + $0x50] sm:$0xff] }
 0x129   : > { %3145 = vmatprep.subr.bf16.mxu0 %v3144_v11  ;;  %584 = vrot.lane.b32.xlu0 %v4080_v14, %s3643_s13  ;;  %v2870_v11 = vld [vmem:[%s3777_s15 + $0x58] sm:$0xff] }
 0x12a   : > { %663 = vrot.lane.b32.xlu1 %v4077_v13, %s3644_s27  ;;  %3162 = vmatprep.subr.bf16.mxu1 %v3640_v3 }
 0x12b   : > { %v814_v15 = vpop.permute.xlu0 %813  ;;  %v816_v20 = vpop.permute.xlu1 %815  ;;  %1456 = vmatprep.mubr.f32.mxu0 %v3647_v7 }
 0x12c   : > { %3164 = vmatpush3.bf16.msra.mxu1 %v3163_v63  ;;  %v833_v29 = vsel %vm829_vm8, %v814_v15, %v816_v20  ;;  %855 = vst.msk [vmem:[#allocation3 + $0x190] sm:$0xff] %vm284_vm0, %v816_v20  ;;  %3147 = vmatpush1.bf16.msra.mxu0 %v3146_v0  ;;  %v3450_v63 = vpack.i.bf16 %v2870_v11, %v2869_v10  ;;  %v2868_v0 = vld [vmem:[%s3777_s15 + $0x48] sm:$0xff] }
 0x12d   : > { %3149 = vmatprep.subr.bf16.mxu0 %v3148_v27  ;;  %665 = vrot.lane.b32.xlu0 %v4080_v14, %s3644_s27  ;;  %v3152_v30 = vpack.c.bf16 %v833_v29, %v752_v4 }
 0x12e   : > { %1998 = vrot.lane.b32.xlu1 %v4253_v28, %s3643_s13  ;;  %3165 = vmatprep.subr.bf16.mxu1 %v3640_v3 }
 0x12f   : > { %v731_v32 = vpop.permute.xlu0 %730  ;;  %v812_v34 = vpop.permute.xlu1 %811  ;;  %v1385_v37 = vld [vmem:[#allocation3 + $0x178] sm:$0xff] }
 0x130   : > { %v751_v35 = vsel %vm748_vm7, %v731_v32, %v733_v9  ;;  %v832_v36 = vsel %vm829_vm8, %v812_v34, %v814_v15  ;;  %3151 = vmatpush1.bf16.msra.mxu0 %v3150_v21  ;;  %v3455_v34 = vpack.i.bf16 %v4004_v24, %v4001_v23 }
 0x131   : > { %2000 = vrot.lane.b32.xlu0 %v4264_v31, %s3643_s13  ;;  %3153 = vmatprep.subr.bf16.mxu0 %v3152_v30  ;;  %v3154_v17 = vpack.c.bf16 %v832_v36, %v751_v35 }
 0x132   : > { %580 = vrot.lane.b32.xlu1 %v4096_v33, %s3643_s13 }
 0x133   : > { %v895_v18 = vpop.permute.xlu0 %894  ;;  %v897_v39 = vpop.permute.xlu1 %896  ;;  %v1388_v41 = vld [vmem:[#allocation3 + $0x190] sm:$0xff] }
 0x134   : > { %v914_v42 = vsel %vm910_vm9, %v895_v18, %v897_v39  ;;  %936 = vst.msk [vmem:[#allocation3 + $0x1a8] sm:$0xff] %vm284_vm0, %v897_v39  ;;  %v3166_v43 = vpack.c.bf16 %v1388_v41, %v1385_v37  ;;  %3155 = vmatpush1.bf16.msra.mxu0 %v3154_v17 }
 0x135   : > { %661 = vrot.lane.b32.xlu0 %v4096_v33, %s3644_s27  ;;  %1408 = vmatprep.subr.mxu0 %v914_v42  ;;  %v3650_v42 = vmov 0  }
 0x136   : > { %1996 = vrot.lane.b32.xlu1 %v4274_v40, %s3643_s13  ;;  %3167 = vmatpush3.bf16.msra.mxu1 %v3166_v43  ;;  %v3470_v43 = vpack.i.bf16 %v4264_v31, %v4253_v28 }
 0x137   : > { %v893_v45 = vpop.permute.xlu0 %892  ;;  %v3392_v46 = vpop.permute.xlu1 %3391  ;;  %3012 = vmatprep.subr.mxu1 %v3647_v7  ;;  %3480 = vset.pattern.permute.xlu0 %v3650_v42 }
 0x138   : > { %v913_v47 = vsel %vm910_vm9, %v893_v45, %v895_v18  ;;  %v3394_v48 = vunpack.i.h.bf16 %v3392_v46  ;;  %v3393_v49 = vunpack.i.l.bf16 %v3392_v46  ;;  %3481 = vset.pattern.permute.xlu1 %v3650_v42 }
 0x139   : > { %744 = vrot.lane.b32.xlu0 %v4077_v13, %s3645_s12  ;;  %1409 = vmatpush1.msra.mxu0 %v913_v47 }
 0x13a   : > { %746 = vrot.lane.b32.xlu1 %v4080_v14, %s3645_s12  ;;  %2822 = vmatmul.mubr.msk.f32.vlgmr.msra.gmra.mrb[4].mxu0 %vm975_vm10, %v4109_v44  ;;  %v1598_v55 = vsel %vm586_vm5, %v3393_v49, %v3394_v48 }
 0x13b   : > { %v3397_v38 = vpop.permute.xlu0 %3396  ;;  %v3402_v50 = vpop.permute.xlu1 %3401  ;;  %v1391_v22 = vld [vmem:[#allocation3 + $0x1a8] sm:$0xff]  ;;  %1686 = vmatprep.mubr.f32.mxu0 %v3647_v7 }
 0x13c   : > { %v3399_v51 = vunpack.i.h.bf16 %v3397_v38  ;;  %v3398_v52 = vunpack.i.l.bf16 %v3397_v38  ;;  %v3404_v53 = vunpack.i.h.bf16 %v3402_v50  ;;  %v3403_v54 = vunpack.i.l.bf16 %v3402_v50  ;;  %3013 = vmatpush3.msra.mxu1 %v1391_v22  ;;  %v2882_v22 = vld [vmem:[%s3777_s15 + $0xb8] sm:$0xff] }
 0x13d   : > { %825 = vrot.lane.b32.xlu0 %v4077_v13, %s3646_s28  ;;  %3176 = vmatprep.subr.bf16.mxu1 %v3640_v3 }
 0x13e   : > { %v3177_v57 = vpack.c.bf16 %v3399_v51, %v3394_v48  ;;  %v1599_v58 = vsel %vm586_vm5, %v3404_v53, %v3398_v52  ;;  %v1597_v59 = vsel %vm586_vm5, %v3403_v54, %v3393_v49  ;;  %827 = vrot.lane.b32.xlu1 %v4080_v14, %s3646_s28  ;;  %3015 = vmatmul.mubr.msk.f32.vlgmr.msra.gmra.mrb[4].mxu1 %vm975_vm10, %v4109_v44  ;;  %v2881_v49 = vld [vmem:[%s3777_s15 + $0xb0] sm:$0xff] }
 0x13f   : > { %v3170_v60 = vpack.c.bf16 %v1599_v58, %v1597_v59  ;;  %v334_v61 = vpop.permute.xlu0 %333  ;;  %v336_v62 = vpop.permute.xlu1 %335  ;;  %v1600_v1 = vsel %vm586_vm5, %v3398_v52, %v3399_v51  ;;  %3027 = vmatprep.mubr.msk.f32.mxu1 %vm3649_vm1, %v3647_v7  ;;  %v3475_v48 = vpack.i.bf16 %v4274_v40, %v4096_v33  ;;  %v2880_v52 = vld [vmem:[%s3777_s15 + $0xa8] sm:$0xff]  ;;  %v267_v40 = vld [vmem:[%s4611_s3] sm:$0xff] }
 0x140   : > { %v4305_v2 = vsel %vm343_vm2, %v334_v61, %v336_v62  ;;  %372 = vst.msk [vmem:[#allocation3 + $0x1d8] sm:$0xff] %vm284_vm0, %v336_v62  ;;  %3178 = vmatpush3.bf16.msra.mxu1 %v3177_v57  ;;  %v3168_v5 = vpack.c.bf16 %v1600_v1, %v1598_v55  ;;  %v268_v55 = vld [vmem:[%s4612_s4] sm:$0xff] }
 0x141   : > { %742 = vrot.lane.b32.xlu0 %v4096_v33, %s3645_s12  ;;  %3179 = vmatprep.subr.bf16.mxu1 %v3640_v3  ;;  %v1773_v58 = vld [vmem:[#allocation3 + $0x1c0] sm:$0xff]  ;;  %s2598_s12 = sshll.u32 %s3846_s20, 4  ;;  %s4550_s12 = int_to_ptr.vmem [resolvable:$true] %s2598_s12 }
 0x142   : > { %823 = vrot.lane.b32.xlu1 %v4096_v33, %s3646_s28  ;;  %3169 = vmatprep.subr.bf16.mxu0 %v3168_v5  ;;  %s3540_s26 = scalar_lea.vmem %s4550_s12, 1536  ;;  %p3547_p12 = scmp.lt.s32.totalorder %s4550_s12, %s3545_s30 }
 0x143   : > { %v332_v8 = vpop.permute.xlu0 %331  ;;  %v3407_v9 = vpop.permute.xlu1 %3406  ;;  %3171 = vmatpush1.bf16.msra.mxu0 %v3170_v60  ;;  %p3541_p3 = scmp.ne.s32.totalorder %s4550_s12, %s3540_s26  ;;  %p3548_p1 = scmp.lt.s32.totalorder %s3546_s29, %s3540_s26 }
 0x144   : > { %v4316_v12 = vsel %vm343_vm2, %v332_v8, %v334_v61  ;;  %v3409_v4 = vunpack.i.h.bf16 %v3407_v9  ;;  %v3408_v6 = vunpack.i.l.bf16 %v3407_v9 }
 0x145   : > { %906 = vrot.lane.b32.xlu0 %v4077_v13, %s3648_s8  ;;  %v3460_v13 = vpack.i.bf16 %v4013_v26, %v2868_v0  ;;  %p3542_p9 = pnand %p3541_p3, %p4637_p8  ;;  %p3549_p2 = por %p3548_p1, %p3547_p12 }
 0x146   : > { %908 = vrot.lane.b32.xlu1 %v4080_v14, %s3648_s8  ;;  %v1602_v27 = vsel %vm586_vm5, %v3408_v6, %v3409_v4 }
 0x147   : > { %v3412_v15 = vpop.permute.xlu0 %3411  ;;  %v3417_v20 = vpop.permute.xlu1 %3416  ;;  %v1776_v59 = vld [vmem:[#allocation3 + $0x1d8] sm:$0xff]  ;;  %p3543_p11 = pneg %p3542_p9 }
 0x148   : > { %v3414_v29 = vunpack.i.h.bf16 %v3412_v15  ;;  %v3413_v30 = vunpack.i.l.bf16 %v3412_v15  ;;  %v3419_v21 = vunpack.i.h.bf16 %v3417_v20  ;;  %v3418_v32 = vunpack.i.l.bf16 %v3417_v20 }
 0x149   : > { %904 = vrot.lane.b32.xlu0 %v4096_v33, %s3648_s8  ;;  %v3199_v1 = vpack.c.bf16 %v1776_v59, %v1773_v58  ;;  %s4636_s8 = sand.u32 1, %s3612_s19   ;;  %p3550_p5 = pnand %p3549_p2, %p3543_p11 }
 0x14a   : > { %v3180_v35 = vpack.c.bf16 %v3414_v29, %v3409_v4  ;;  %v1603_v14 = vsel %vm586_vm5, %v3419_v21, %v3413_v30  ;;  %v1601_v36 = vsel %vm586_vm5, %v3418_v32, %v3408_v6  ;;  %3451 = vrot.lane.b32.xlu1 %v3450_v63, %s3643_s13  ;;  %v1604_v37 = vsel %vm586_vm5, %v3413_v30, %v3414_v29  ;;  %s4556_s17 = scalar_lea.sflag [#allocation6], %s4636_s8 }
 0x14b   : > { %v3174_v17 = vpack.c.bf16 %v1603_v14, %v1601_v36  ;;  %v415_v18 = vpop.permute.xlu0 %414  ;;  %v417_v39 = vpop.permute.xlu1 %416  ;;  %v3172_v41 = vpack.c.bf16 %v1604_v37, %v1602_v27  ;;  %v3182_v29 = vpack.c.bf16 %v4305_v2, %v4001_v23  ;;  %v3184_v21 = vpack.c.bf16 %v4316_v12, %v4013_v26 }
 0x14c   : > { %v4334_v24 = vsel %vm424_vm3, %v415_v18, %v417_v39  ;;  %453 = vst.msk [vmem:[#allocation3 + $0x1f0] sm:$0xff] %vm284_vm0, %v417_v39  ;;  %3181 = vmatpush3.bf16.msra.mxu1 %v3180_v35 }
 0x14d   : > { %3456 = vrot.lane.b32.xlu0 %v3455_v34, %s3643_s13  ;;  %3173 = vmatprep.subr.bf16.mxu0 %v3172_v41 }
 0x14e   : > { %3461 = vrot.lane.b32.xlu1 %v3460_v13, %s3643_s13  ;;  %3175 = vmatpush1.bf16.msra.mxu0 %v3174_v17 }
 0x14f   : > { %v496_v45 = vpop.permute.xlu0 %495  ;;  %v498_v46 = vpop.permute.xlu1 %497  ;;  %3025 = vmatprep.subr.mxu1 %v3647_v7 }
 0x150   : > { %v4343_v47 = vsel %vm505_vm4, %v496_v45, %v498_v46  ;;  %534 = vst.msk [vmem:[#allocation3 + $0x208] sm:$0xff] %vm284_vm0, %v498_v46 }
 0x151   : > { %3466 = vrot.lane.b32.xlu0 %v4185_v19, %s3643_s13  ;;  %v3186_v32 = vpack.c.bf16 %v4343_v47, %v4334_v24 }
 0x152   : > { %3471 = vrot.lane.b32.xlu1 %v3470_v43, %s3643_s13 }
 0x153   : > { %v413_v28 = vpop.permute.xlu0 %412  ;;  %v494_v31 = vpop.permute.xlu1 %493  ;;  %v1779_v5 = vld [vmem:[#allocation3 + $0x1f0] sm:$0xff] }
 0x154   : > { %v4353_v38 = vsel %vm424_vm3, %v413_v28, %v415_v18  ;;  %v4356_v50 = vsel %vm505_vm4, %v494_v31, %v496_v45 }
 0x155   : > { %3476 = vrot.lane.b32.xlu0 %v3475_v48, %s3643_s13  ;;  %v3188_v23 = vpack.c.bf16 %v4356_v50, %v4353_v38 }
 0x156   : > { %2404 = vrot.lane.b32.xlu1 %v2881_v49, %s3643_s13 }
 0x157   : > { %v577_v19 = vpop.permute.xlu0 %576  ;;  %v579_v51 = vpop.permute.xlu1 %578  ;;  %v1782_v8 = vld [vmem:[#allocation3 + $0x208] sm:$0xff] }
 0x158   : > { %v4363_v33 = vsel %vm586_vm5, %v577_v19, %v579_v51  ;;  %615 = vst.msk [vmem:[#allocation3 + $0x220] sm:$0xff] %vm284_vm0, %v579_v51  ;;  %v3202_v6 = vpack.c.bf16 %v1782_v8, %v1779_v5 }
 0x159   : > { %2406 = vrot.lane.b32.xlu0 %v2882_v22, %s3643_s13 }
 0x15a   : > { %2402 = vrot.lane.b32.xlu1 %v2880_v52, %s3643_s13  ;;  %s2595_s13 = sadd.s32 %s3268_s23, %s4635_s24 }
 0x15b   : > { %v658_v53 = vpop.permute.xlu0 %657  ;;  %v660_v54 = vpop.permute.xlu1 %659  ;;  %s2890_s27 = sshll.u32 %s2595_s13, 7 }
 0x15c   : > { %v673_v57 = vsel %vm667_vm6, %v658_v53, %v660_v54  ;;  %696 = vst.msk [vmem:[#allocation3 + $0x238] sm:$0xff] %vm284_vm0, %v660_v54  ;;  %s4548_s28 = scalar_lea.hbm %s4613_s5, %s2890_s27 }
 0x15d   : > { %972 = vperm.xlu0 %3480, %v267_v40   ;;  %v3190_v26 = vpack.c.bf16 %v673_v57, %v4363_v33 }
 0x15e   : > { %1140 = vperm.xlu1 %3481, %v268_v55  }
 0x15f   : > { %v1594_v60 = vpop.permute.xlu0 %1593  ;;  %v1596_v61 = vpop.permute.xlu1 %1595  ;;  %v1785_v63 = vld [vmem:[#allocation3 + $0x220] sm:$0xff] }
 0x160   : > { %3026 = vmatpush3.msra.mxu1 %v1596_v61  ;;  %v1606_v62 = vsel %vm586_vm5, %v1594_v60, %v1596_v61 }
 0x161   : > { %1630 = vmatprep.subr.mxu0 %v1606_v62  ;;  %3198 = vmatprep.subr.bf16.mxu1 %v3640_v3 }
 0x162   : > { %3028 = vmatmul.mubr.msk.f32.vlgmr.msra.gmra.mrb[6].mxu1 %vm1213_vm11, %v4216_v56 }
 0x163   : > { %3200 = vmatpush3.bf16.msra.mxu1 %v3199_v1  ;;  %v575_v9 = vpop.permute.xlu0 %574  ;;  %v656_v10 = vpop.permute.xlu1 %655  ;;  %3048 = vmatprep.mubr.msk.f32.mxu1 %vm3649_vm1, %v3647_v7  ;;  %v1788_v0 = vld [vmem:[#allocation3 + $0x238] sm:$0xff] }
 0x164   : > { %v591_v11 = vsel %vm586_vm5, %v575_v9, %v577_v19  ;;  %v672_v4 = vsel %vm667_vm6, %v656_v10, %v658_v53  ;;  %3201 = vmatprep.subr.bf16.mxu1 %v3640_v3  ;;  %v3205_v30 = vpack.c.bf16 %v1788_v0, %v1785_v63 }
 0x165   : > { %v3192_v37 = vpack.c.bf16 %v672_v4, %v591_v11 }
 0x167   : > { %3203 = vmatpush3.bf16.msra.mxu1 %v3202_v6  ;;  %v1592_v15 = vpop.permute.xlu0 %1591  ;;  %v739_v20 = vpop.permute.xlu1 %738 }
 0x168   : > { %v1605_v27 = vsel %vm586_vm5, %v1592_v15, %v1594_v60  ;;  %3204 = vmatprep.subr.bf16.mxu1 %v3640_v3 }
 0x169   : > { %1631 = vmatpush1.msra.mxu0 %v1605_v27 }
 0x16a   : > { %3183 = vmatprep.subr.bf16.mxu0 %v3182_v29  ;;  %2839 = vmatmul.mubr.msk.f32.vlgmr.msra.gmra.mrb[6].mxu0 %vm1213_vm11, %v4216_v56 }
 0x16b   : > { %3206 = vmatpush3.bf16.msra.mxu1 %v3205_v30  ;;  %v741_v34 = vpop.permute.xlu0 %740  ;;  %v820_v13 = vpop.permute.xlu1 %819  ;;  %3185 = vmatpush1.bf16.msra.mxu0 %v3184_v21 }
 0x16c   : > { %v754_v35 = vsel %vm748_vm7, %v739_v20, %v741_v34  ;;  %777 = vst.msk [vmem:[#allocation3 + $0x250] sm:$0xff] %vm284_vm0, %v741_v34  ;;  %3187 = vmatprep.subr.bf16.mxu0 %v3186_v32  ;;  %3207 = vmatprep.subr.bf16.mxu1 %v3640_v3 }
 0x16d   : > { %1862 = vmatprep.mubr.f32.mxu0 %v3647_v7 }
 0x16f   : > { %v822_v2 = vpop.permute.xlu0 %821  ;;  %v737_v12 = vpop.permute.xlu1 %736  ;;  %3189 = vmatpush1.bf16.msra.mxu0 %v3188_v23 }
 0x170   : > { %v835_v14 = vsel %vm829_vm8, %v820_v13, %v822_v2  ;;  %858 = vst.msk [vmem:[#allocation3 + $0x268] sm:$0xff] %vm284_vm0, %v822_v2  ;;  %v753_v36 = vsel %vm748_vm7, %v737_v12, %v739_v20  ;;  %3191 = vmatprep.subr.bf16.mxu0 %v3190_v26 }
 0x171   : > { %v3194_v17 = vpack.c.bf16 %v835_v14, %v754_v35 }
 0x173   : > { %v818_v18 = vpop.permute.xlu0 %817  ;;  %v901_v39 = vpop.permute.xlu1 %900  ;;  %3193 = vmatpush1.bf16.msra.mxu0 %v3192_v37  ;;  %v1791_v45 = vld [vmem:[#allocation3 + $0x250] sm:$0xff] }
 0x174   : > { %v834_v41 = vsel %vm829_vm8, %v818_v18, %v820_v13  ;;  %3195 = vmatprep.subr.bf16.mxu0 %v3194_v17 }
 0x175   : > { %v3196_v42 = vpack.c.bf16 %v834_v41, %v753_v36 }
 0x177   : > { %v903_v24 = vpop.permute.xlu0 %902  ;;  %v899_v43 = vpop.permute.xlu1 %898  ;;  %v1794_v46 = vld [vmem:[#allocation3 + $0x268] sm:$0xff]  ;;  %3197 = vmatpush1.bf16.msra.mxu0 %v3196_v42 }
 0x178   : > { %v916_v47 = vsel %vm910_vm9, %v901_v39, %v903_v24  ;;  %939 = vst.msk [vmem:[#allocation3 + $0x280] sm:$0xff] %vm284_vm0, %v903_v24  ;;  %v915_v48 = vsel %vm910_vm9, %v899_v43, %v901_v39  ;;  %v3208_v28 = vpack.c.bf16 %v1794_v46, %v1791_v45  ;;  %v2178_v46 = vld [vmem:[#allocation3 + $0x298] sm:$0xff] }
 0x179   : > { %1814 = vmatprep.subr.mxu0 %v916_v47 }
 0x17a   : > { %3209 = vmatpush3.bf16.msra.mxu1 %v3208_v28 }
 0x17b   : > { %v3422_v31 = vpop.permute.xlu0 %3421  ;;  %v3427_v49 = vpop.permute.xlu1 %3426  ;;  %3046 = vmatprep.subr.mxu1 %v3647_v7  ;;  %1815 = vmatpush1.msra.mxu0 %v915_v48 }
 0x17c   : > { %v3424_v38 = vunpack.i.h.bf16 %v3422_v31  ;;  %v3423_v50 = vunpack.i.l.bf16 %v3422_v31  ;;  %v3429_v22 = vunpack.i.h.bf16 %v3427_v49  ;;  %v3428_v19 = vunpack.i.l.bf16 %v3427_v49  ;;  %2844 = vmatmul.mubr.msk.f32.vlgmr.msra.gmra.mrb[8].mxu0 %vm975_vm10, %v4109_v44 }
 0x17d   : > { %2091 = vmatprep.mubr.f32.mxu0 %v3647_v7 }
 0x17e   : > { %v2003_v51 = vsel %vm586_vm5, %v3423_v50, %v3424_v38  ;;  %v2005_v52 = vsel %vm586_vm5, %v3428_v19, %v3429_v22  ;;  %v3219_v55 = vpack.c.bf16 %v3429_v22, %v3424_v38 }
 0x17f   : > { %v3432_v33 = vpop.permute.xlu0 %3431  ;;  %v340_v40 = vpop.permute.xlu1 %339  ;;  %v1797_v53 = vld [vmem:[#allocation3 + $0x280] sm:$0xff]  ;;  %v3210_v54 = vpack.c.bf16 %v2005_v52, %v2003_v51 }
 0x180   : > { %v3434_v57 = vunpack.i.h.bf16 %v3432_v33  ;;  %v3433_v58 = vunpack.i.l.bf16 %v3432_v33  ;;  %3047 = vmatpush3.msra.mxu1 %v1797_v53 }
 0x181   : > { %3218 = vmatprep.subr.bf16.mxu1 %v3640_v3  ;;  %3049 = vmatmul.mubr.msk.f32.vlgmr.msra.gmra.mrb[8].mxu1 %vm975_vm10, %v4109_v44 }
 0x182   : > { %v2002_v59 = vsel %vm586_vm5, %v3433_v58, %v3423_v50  ;;  %v2004_v60 = vsel %vm586_vm5, %v3434_v57, %v3428_v19  ;;  %3220 = vmatpush3.bf16.msra.mxu1 %v3219_v55  ;;  %3211 = vmatprep.subr.bf16.mxu0 %v3210_v54 }
 0x183   : > { %v3212_v61 = vpack.c.bf16 %v2004_v60, %v2002_v59  ;;  %v342_v62 = vpop.permute.xlu0 %341  ;;  %v338_v1 = vpop.permute.xlu1 %337  ;;  %3221 = vmatprep.subr.bf16.mxu1 %v3640_v3  ;;  %3061 = vmatprep.mubr.msk.f32.mxu1 %vm3649_vm1, %v3647_v7 }
 0x184   : > { %v4424_v5 = vsel %vm343_vm2, %v340_v40, %v342_v62  ;;  %375 = vst.msk [vmem:[#allocation3 + $0x2b0] sm:$0xff] %vm284_vm0, %v342_v62  ;;  %v4428_v44 = vsel %vm343_vm2, %v338_v1, %v340_v40 }
 0x185   : > { %3213 = vmatpush1.bf16.msra.mxu0 %v3212_v61  ;;  %v3224_v40 = vpack.c.bf16 %v4424_v5, %v4152_v16  ;;  %v3226_v57 = vpack.c.bf16 %v4428_v44, %v4155_v25 }
 0x187   : > { %v3437_v8 = vpop.permute.xlu0 %3436  ;;  %v3442_v9 = vpop.permute.xlu1 %3441 }
 0x188   : > { %v3439_v10 = vunpack.i.h.bf16 %v3437_v8  ;;  %v3438_v11 = vunpack.i.l.bf16 %v3437_v8  ;;  %v3444_v4 = vunpack.i.h.bf16 %v3442_v9  ;;  %v3443_v6 = vunpack.i.l.bf16 %v3442_v9 }
 0x18a   : > { %v3222_v63 = vpack.c.bf16 %v3444_v4, %v3439_v10  ;;  %v2007_v0 = vsel %vm586_vm5, %v3438_v11, %v3439_v10  ;;  %v2009_v15 = vsel %vm586_vm5, %v3443_v6, %v3444_v4 }
 0x18b   : > { %v3447_v20 = vpop.permute.xlu0 %3446  ;;  %v421_v27 = vpop.permute.xlu1 %420  ;;  %v3214_v29 = vpack.c.bf16 %v2009_v15, %v2007_v0  ;;  %v2181_v47 = vld [vmem:[#allocation3 + $0x2b0] sm:$0xff] }
 0x18c   : > { %v3449_v30 = vunpack.i.h.bf16 %v3447_v20  ;;  %v3448_v21 = vunpack.i.l.bf16 %v3447_v20  ;;  %3223 = vmatpush3.bf16.msra.mxu1 %v3222_v63  ;;  %v3241_v38 = vpack.c.bf16 %v2181_v47, %v2178_v46 }
 0x18d   : > { %3215 = vmatprep.subr.bf16.mxu0 %v3214_v29  ;;  %3059 = vmatprep.subr.mxu1 %v3647_v7 }
 0x18e   : > { %v2006_v32 = vsel %vm586_vm5, %v3448_v21, %v3438_v11  ;;  %v2008_v34 = vsel %vm586_vm5, %v3449_v30, %v3443_v6 }
 0x18f   : > { %v3216_v13 = vpack.c.bf16 %v2008_v34, %v2006_v32  ;;  %v423_v35 = vpop.permute.xlu0 %422  ;;  %v502_v23 = vpop.permute.xlu1 %501 }
 0x190   : > { %v432_v26 = vsel %vm424_vm3, %v421_v27, %v423_v35  ;;  %456 = vst.msk [vmem:[#allocation3 + $0x2c8] sm:$0xff] %vm284_vm0, %v423_v35 }
 0x191   : > { %3217 = vmatpush1.bf16.msra.mxu0 %v3216_v13 }
 0x193   : > { %v504_v2 = vpop.permute.xlu0 %503  ;;  %v419_v12 = vpop.permute.xlu1 %418 }
 0x194   : > { %v513_v14 = vsel %vm505_vm4, %v502_v23, %v504_v2  ;;  %537 = vst.msk [vmem:[#allocation3 + $0x2e0] sm:$0xff] %vm284_vm0, %v504_v2  ;;  %v431_v36 = vsel %vm424_vm3, %v419_v12, %v421_v27 }
 0x195   : > { %v3228_v59 = vpack.c.bf16 %v513_v14, %v432_v26 }
 0x197   : > { %v500_v37 = vpop.permute.xlu0 %499  ;;  %v583_v17 = vpop.permute.xlu1 %582  ;;  %v2184_v52 = vld [vmem:[#allocation3 + $0x2c8] sm:$0xff] }
 0x198   : > { %v512_v18 = vsel %vm505_vm4, %v500_v37, %v502_v23  ;;  %v3482_v23 = vld [vmem:[%s4609_s1] sm:$0xff] }
 0x199   : > { %v3230_v25 = vpack.c.bf16 %v512_v18, %v431_v36 }
 0x19b   : > { %v585_v39 = vpop.permute.xlu0 %584  ;;  %v2187_v50 = vld [vmem:[#allocation3 + $0x2e0] sm:$0xff] }
 0x19c   : > { %v594_v41 = vsel %vm586_vm5, %v583_v17, %v585_v39  ;;  %618 = vst.msk [vmem:[#allocation3 + $0x2f8] sm:$0xff] %vm284_vm0, %v585_v39  ;;  %v664_v42 = vpop.permute.xlu1 %663  ;;  %v3244_v53 = vpack.c.bf16 %v2187_v50, %v2184_v52 }
 0x19f   : > { %v666_v24 = vpop.permute.xlu0 %665 }
 0x1a0   : > { %v675_v43 = vsel %vm667_vm6, %v664_v42, %v666_v24  ;;  %699 = vst.msk [vmem:[#allocation3 + $0x310] sm:$0xff] %vm284_vm0, %v666_v24  ;;  %v1999_v45 = vpop.permute.xlu1 %1998 }
 0x1a1   : > { %v3232_v5 = vpack.c.bf16 %v675_v43, %v594_v41 }
 0x1a3   : > { %v2001_v48 = vpop.permute.xlu0 %2000  ;;  %v2190_v60 = vld [vmem:[#allocation3 + $0x2f8] sm:$0xff] }
 0x1a4   : > { %v581_v28 = vpop.permute.xlu1 %580  ;;  %3060 = vmatpush3.msra.mxu1 %v2001_v48  ;;  %v2011_v31 = vsel %vm586_vm5, %v1999_v45, %v2001_v48 }
 0x1a5   : > { %v593_v49 = vsel %vm586_vm5, %v581_v28, %v583_v17  ;;  %2035 = vmatprep.subr.mxu0 %v2011_v31  ;;  %3240 = vmatprep.subr.bf16.mxu1 %v3640_v3 }
 0x1a6   : > { %3062 = vmatmul.mubr.msk.f32.vlgmr.msra.gmra.mrb[10].mxu1 %vm1213_vm11, %v4216_v56 }
 0x1a7   : > { %3242 = vmatpush3.bf16.msra.mxu1 %v3241_v38  ;;  %v662_v22 = vpop.permute.xlu0 %661  ;;  %3082 = vmatprep.mubr.msk.f32.mxu1 %vm3649_vm1, %v3647_v7  ;;  %v2193_v54 = vld [vmem:[#allocation3 + $0x310] sm:$0xff] }
 0x1a8   : > { %v674_v19 = vsel %vm667_vm6, %v662_v22, %v664_v42  ;;  %v1997_v51 = vpop.permute.xlu1 %1996  ;;  %3243 = vmatprep.subr.bf16.mxu1 %v3640_v3  ;;  %v3247_v16 = vpack.c.bf16 %v2193_v54, %v2190_v60 }
 0x1a9   : > { %v2010_v33 = vsel %vm586_vm5, %v1997_v51, %v1999_v45  ;;  %v3234_v10 = vpack.c.bf16 %v674_v19, %v593_v49 }
 0x1aa   : > { %2036 = vmatpush1.msra.mxu0 %v2010_v33 }
 0x1ab   : > { %3225 = vmatprep.subr.bf16.mxu0 %v3224_v40  ;;  %3245 = vmatpush3.bf16.msra.mxu1 %v3244_v53  ;;  %v745_v55 = vpop.permute.xlu0 %744 }
 0x1ac   : > { %v747_v58 = vpop.permute.xlu1 %746  ;;  %2861 = vmatmul.mubr.msk.f32.vlgmr.msra.gmra.mrb[10].mxu0 %vm1213_vm11, %v4216_v56  ;;  %3246 = vmatprep.subr.bf16.mxu1 %v3640_v3 }
 0x1ad   : > { %v756_v61 = vsel %vm748_vm7, %v745_v55, %v747_v58  ;;  %780 = vst.msk [vmem:[#allocation3 + $0x328] sm:$0xff] %vm284_vm0, %v747_v58  ;;  %3227 = vmatpush1.bf16.msra.mxu0 %v3226_v57  ;;  %2267 = vmatprep.mubr.f32.mxu0 %v3647_v7 }
 0x1ae   : > { %3229 = vmatprep.subr.bf16.mxu0 %v3228_v59 }
 0x1af   : > { %3248 = vmatpush3.bf16.msra.mxu1 %v3247_v16  ;;  %v826_v62 = vpop.permute.xlu0 %825 }
 0x1b0   : > { %v828_v1 = vpop.permute.xlu1 %827  ;;  %3249 = vmatprep.subr.bf16.mxu1 %v3640_v3 }
 0x1b1   : > { %v837_v44 = vsel %vm829_vm8, %v826_v62, %v828_v1  ;;  %861 = vst.msk [vmem:[#allocation3 + $0x340] sm:$0xff] %vm284_vm0, %v828_v1  ;;  %3231 = vmatpush1.bf16.msra.mxu0 %v3230_v25 }
 0x1b2   : > { %3233 = vmatprep.subr.bf16.mxu0 %v3232_v5  ;;  %v3236_v8 = vpack.c.bf16 %v837_v44, %v756_v61 }
 0x1b3   : > { %v743_v9 = vpop.permute.xlu0 %742 }
 0x1b4   : > { %v755_v11 = vsel %vm748_vm7, %v743_v9, %v745_v55  ;;  %v824_v4 = vpop.permute.xlu1 %823  ;;  %v2196_v63 = vld [vmem:[#allocation3 + $0x328] sm:$0xff] }
 0x1b5   : > { %v836_v6 = vsel %vm829_vm8, %v824_v4, %v826_v62  ;;  %3235 = vmatpush1.bf16.msra.mxu0 %v3234_v10 }
 0x1b6   : > { %3237 = vmatprep.subr.bf16.mxu0 %v3236_v8  ;;  %v3238_v0 = vpack.c.bf16 %v836_v6, %v755_v11 }
 0x1b7   : > { %v907_v15 = vpop.permute.xlu0 %906 }
 0x1b8   : > { %v909_v20 = vpop.permute.xlu1 %908  ;;  %v2199_v27 = vld [vmem:[#allocation3 + $0x340] sm:$0xff] }
 0x1b9   : > { %v918_v29 = vsel %vm910_vm9, %v907_v15, %v909_v20  ;;  %942 = vst.msk [vmem:[#allocation3 + $0x358] sm:$0xff] %vm284_vm0, %v909_v20  ;;  %v3250_v30 = vpack.c.bf16 %v2199_v27, %v2196_v63  ;;  %3239 = vmatpush1.bf16.msra.mxu0 %v3238_v0 }
 0x1ba   : > { %2219 = vmatprep.subr.mxu0 %v918_v29 }
 0x1bb   : > { %3251 = vmatpush3.bf16.msra.mxu1 %v3250_v30  ;;  %v905_v21 = vpop.permute.xlu0 %904 }
 0x1bc   : > { %v917_v32 = vsel %vm910_vm9, %v905_v21, %v907_v15  ;;  %v3452_v34 = vpop.permute.xlu1 %3451  ;;  %3080 = vmatprep.subr.mxu1 %v3647_v7 }
 0x1bd   : > { %v3454_v13 = vunpack.i.h.bf16 %v3452_v34  ;;  %v3453_v35 = vunpack.i.l.bf16 %v3452_v34  ;;  %2220 = vmatpush1.msra.mxu0 %v917_v32 }
 0x1be   : > { %2866 = vmatmul.mubr.msk.f32.vlgmr.msra.gmra.mrb[12].mxu0 %vm975_vm10, %v3482_v23 }
 0x1bf   : > { %v3457_v26 = vpop.permute.xlu0 %3456  ;;  %2497 = vmatprep.mubr.f32.mxu0 %v3647_v7  ;;  %v2409_v37 = vsel %vm586_vm5, %v3453_v35, %v3454_v13 }
 0x1c0   : > { %v3459_v2 = vunpack.i.h.bf16 %v3457_v26  ;;  %v3458_v12 = vunpack.i.l.bf16 %v3457_v26  ;;  %v3462_v14 = vpop.permute.xlu1 %3461  ;;  %v2202_v36 = vld [vmem:[#allocation3 + $0x358] sm:$0xff] }
 0x1c1   : > { %v3464_v17 = vunpack.i.h.bf16 %v3462_v14  ;;  %v3463_v18 = vunpack.i.l.bf16 %v3462_v14  ;;  %3081 = vmatpush3.msra.mxu1 %v2202_v36 }
 0x1c2   : > { %v3261_v39 = vpack.c.bf16 %v3459_v2, %v3454_v13  ;;  %3260 = vmatprep.subr.bf16.mxu1 %v3640_v3  ;;  %3083 = vmatmul.mubr.msk.f32.vlgmr.msra.gmra.mrb[12].mxu1 %vm975_vm10, %v3482_v23  ;;  %v2411_v41 = vsel %vm586_vm5, %v3458_v12, %v3459_v2 }
 0x1c3   : > { %v2410_v42 = vsel %vm586_vm5, %v3464_v17, %v3458_v12  ;;  %v2408_v24 = vsel %vm586_vm5, %v3463_v18, %v3453_v35  ;;  %v3467_v43 = vpop.permute.xlu0 %3466  ;;  %v3252_v45 = vpack.c.bf16 %v2411_v41, %v2409_v37  ;;  %3095 = vmatprep.mubr.msk.f32.mxu1 %vm3649_vm1, %v3647_v7 }
 0x1c4   : > { %v3254_v46 = vpack.c.bf16 %v2410_v42, %v2408_v24  ;;  %v3469_v47 = vunpack.i.h.bf16 %v3467_v43  ;;  %v3468_v48 = vunpack.i.l.bf16 %v3467_v43  ;;  %v3472_v28 = vpop.permute.xlu1 %3471  ;;  %3262 = vmatpush3.bf16.msra.mxu1 %v3261_v39 }
 0x1c5   : > { %v3474_v31 = vunpack.i.h.bf16 %v3472_v28  ;;  %v3473_v49 = vunpack.i.l.bf16 %v3472_v28  ;;  %3253 = vmatprep.subr.bf16.mxu0 %v3252_v45  ;;  %3263 = vmatprep.subr.bf16.mxu1 %v3640_v3 }
 0x1c6   : > { %3255 = vmatpush1.bf16.msra.mxu0 %v3254_v46  ;;  %v2413_v38 = vsel %vm586_vm5, %v3468_v48, %v3469_v47 }
 0x1c7   : > { %v3264_v50 = vpack.c.bf16 %v3474_v31, %v3469_v47  ;;  %v3477_v22 = vpop.permute.xlu0 %3476  ;;  %v2415_v19 = vsel %vm586_vm5, %v3473_v49, %v3474_v31 }
 0x1c8   : > { %v3479_v51 = vunpack.i.h.bf16 %v3477_v22  ;;  %v3478_v52 = vunpack.i.l.bf16 %v3477_v22  ;;  %v2405_v33 = vpop.permute.xlu1 %2404  ;;  %v3256_v40 = vpack.c.bf16 %v2415_v19, %v2413_v38 }
 0x1c9   : > { %3265 = vmatpush3.bf16.msra.mxu1 %v3264_v50 }
 0x1ca   : > { %v2412_v53 = vsel %vm586_vm5, %v3478_v52, %v3468_v48  ;;  %v2414_v54 = vsel %vm586_vm5, %v3479_v51, %v3473_v49  ;;  %3257 = vmatprep.subr.bf16.mxu0 %v3256_v40  ;;  %3093 = vmatprep.subr.mxu1 %v3647_v7 }
 0x1cb   : > { %v3258_v3 = vpack.c.bf16 %v2414_v54, %v2412_v53  ;;  %v2407_v55 = vpop.permute.xlu0 %2406  ;;  %v1045_v57 = vpop.f32.mrb[0].mxu0 }
 0x1cc   : > { %v2417_v58 = vsel %vm586_vm5, %v2405_v33, %v2407_v55  ;;  %v1047_v59 = vpop.f32.mrb[1].mxu0  ;;  %v2403_v60 = vpop.permute.xlu1 %2402 }
 0x1cd   : > { %3094 = vmatpush3.msra.mxu1 %v2407_v55  ;;  %3259 = vmatpush1.bf16.msra.mxu0 %v3258_v3  ;;  %v2416_v61 = vsel %vm586_vm5, %v2403_v60, %v2405_v33 }
 0x1ce   : > { %3096 = vmatmul.mubr.msk.f32.vlgmr.msra.gmra.mrb[14].mxu1 %vm1213_vm11, %v4216_v56  ;;  %2441 = vmatprep.subr.mxu0 %v2417_v58 }
 0x1d1   : > { %2442 = vmatpush1.msra.mxu0 %v2416_v61  ;;  %v1116_v16 = vpop.f32.mrb[0].mxu1 }
 0x1d2   : > { %2883 = vmatmul.mubr.msk.f32.vlgmr.msra.gmra.mrb[14].mxu0 %vm1213_vm11, %v4216_v56  ;;  %v2982_v7 = vpop.f32.mrb[1].mxu1 }
 0x1dc   : > { %v4499_v62 = vpop.permute.xlu0 %972 }
 0x1dd   : > { %v1117_v25 = vadd.f32 %v1116_v16, %v4499_v62  ;;  %v4502_v1 = vpop.permute.xlu1 %1140  ;;  %v1046_v5 = vadd.f32 %v1045_v57, %v4499_v62  ;;  %v1048_v8 = vadd.f32 %v1047_v59, %v4499_v62 }
 0x1df   : > { %v1122_v44 = vmax.f32 %v1117_v25, 0.0  ;;  %v1120_v56 = vmax.f32 %v1046_v5, 0.0  ;;  %v1121_v6 = vmax.f32 %v1048_v8, 0.0 }
 0x1f6   : > { %v1354_v9 = vpop.f32.mrb[2].mxu1 }
 0x1f7   : > { %v1355_v10 = vadd.f32 %v1354_v9, %v4502_v1  ;;  %v2995_v11 = vpop.f32.mrb[3].mxu1 }
 0x1f9   : > { %v1360_v4 = vadd.f32 %v1355_v10, %v1122_v44 }
 0x1fa   : > { %v1283_v63 = vpop.f32.mrb[2].mxu0 }
 0x1fb   : > { %v1284_v0 = vadd.f32 %v1283_v63, %v4502_v1  ;;  %v1285_v15 = vpop.f32.mrb[3].mxu0  ;;  %1363 = vst.msk [vmem:[%s3846_s20 + $0x10] sm:$0xff] %vm284_vm0, %v1360_v4 }
 0x1fc   : > { %v1286_v20 = vadd.f32 %v1285_v15, %v4502_v1 }
 0x1fd   : > { %v1358_v27 = vadd.f32 %v1284_v0, %v1120_v56 }
 0x1fe   : > { %v1359_v29 = vadd.f32 %v1286_v20, %v1121_v6 }
 0x1ff   : > { %1361 = vst [vmem:[%s3846_s20] sm:$0xff] %v1358_v27 }
 0x200   : > { %1362 = vst [vmem:[%s3846_s20 + $0x8] sm:$0xff] %v1359_v29 }
 0x20d   : > { %v1458_v30 = vpop.f32.mrb[4].mxu0 }
 0x20e   : > { %v1460_v21 = vpop.f32.mrb[5].mxu0  ;;  %v1459_v12 = vadd.f32 %v1458_v30, %v4499_v62 }
 0x20f   : > { %v1461_v36 = vadd.f32 %v1460_v21, %v4499_v62 }
 0x210   : > { %v1533_v37 = vmax.f32 %v1459_v12, 0.0 }
 0x211   : > { %v1529_v32 = vpop.f32.mrb[4].mxu1  ;;  %v1534_v17 = vmax.f32 %v1461_v36, 0.0 }
 0x212   : > { %v3016_v34 = vpop.f32.mrb[5].mxu1  ;;  %v1530_v13 = vadd.f32 %v1529_v32, %v4499_v62 }
 0x214   : > { %v1535_v35 = vmax.f32 %v1530_v13, 0.0 }
 0x235   : > { %v1759_v23 = vpop.f32.mrb[6].mxu1 }
 0x236   : > { %v1760_v26 = vadd.f32 %v1759_v23, %v4502_v1  ;;  %v3029_v2 = vpop.f32.mrb[7].mxu1 }
 0x238   : > { %v1765_v14 = vadd.f32 %v1760_v26, %v1535_v35 }
 0x23a   : > { %2843 = vst.msk [vmem:[%s3846_s20 + $0x28] sm:$0xff] %vm284_vm0, %v1765_v14 }
 0x23d   : > { %v1688_v18 = vpop.f32.mrb[6].mxu0 }
 0x23e   : > { %v1689_v39 = vadd.f32 %v1688_v18, %v4502_v1  ;;  %v1690_v41 = vpop.f32.mrb[7].mxu0 }
 0x23f   : > { %v1691_v42 = vadd.f32 %v1690_v41, %v4502_v1 }
 0x240   : > { %v1763_v24 = vadd.f32 %v1689_v39, %v1533_v37 }
 0x241   : > { %v1764_v43 = vadd.f32 %v1691_v42, %v1534_v17 }
 0x242   : > { %2841 = vst [vmem:[%s3846_s20 + $0x18] sm:$0xff] %v1763_v24 }
 0x243   : > { %2842 = vst [vmem:[%s3846_s20 + $0x20] sm:$0xff] %v1764_v43 }
 0x24f   : > { %v1864_v45 = vpop.f32.mrb[8].mxu0 }
 0x250   : > { %v1866_v46 = vpop.f32.mrb[9].mxu0  ;;  %v1865_v38 = vadd.f32 %v1864_v45, %v4499_v62 }
 0x251   : > { %v1867_v19 = vadd.f32 %v1866_v46, %v4499_v62 }
 0x252   : > { %v1939_v52 = vmax.f32 %v1865_v38, 0.0 }
 0x253   : > { %v1940_v33 = vmax.f32 %v1867_v19, 0.0 }
 0x254   : > { %v1935_v47 = vpop.f32.mrb[8].mxu1 }
 0x255   : > { %v3050_v48 = vpop.f32.mrb[9].mxu1  ;;  %v1936_v28 = vadd.f32 %v1935_v47, %v4499_v62 }
 0x257   : > { %v1941_v31 = vmax.f32 %v1936_v28, 0.0 }
 0x279   : > { %v2164_v49 = vpop.f32.mrb[10].mxu1 }
 0x27a   : > { %v2165_v50 = vadd.f32 %v2164_v49, %v4502_v1  ;;  %v3063_v22 = vpop.f32.mrb[11].mxu1 }
 0x27c   : > { %v2170_v51 = vadd.f32 %v2165_v50, %v1941_v31 }
 0x27e   : > { %2865 = vst.msk [vmem:[%s3846_s20 + $0x40] sm:$0xff] %vm284_vm0, %v2170_v51 }
 0x27f   : > { %v2093_v40 = vpop.f32.mrb[10].mxu0 }
 0x280   : > { %v2094_v53 = vadd.f32 %v2093_v40, %v4502_v1  ;;  %v2095_v54 = vpop.f32.mrb[11].mxu0 }
 0x281   : > { %v2096_v3 = vadd.f32 %v2095_v54, %v4502_v1 }
 0x282   : > { %v2168_v55 = vadd.f32 %v2094_v53, %v1939_v52 }
 0x283   : > { %v2169_v57 = vadd.f32 %v2096_v3, %v1940_v33 }
 0x284   : > { %2863 = vst [vmem:[%s3846_s20 + $0x30] sm:$0xff] %v2168_v55 }
 0x285   : > { %2864 = vst [vmem:[%s3846_s20 + $0x38] sm:$0xff] %v2169_v57 }
 0x291   : > { %v2269_v58 = vpop.f32.mrb[12].mxu0 }
 0x292   : > { %v2271_v59 = vpop.f32.mrb[13].mxu0  ;;  %v2270_v5 = vadd.f32 %v2269_v58, %v4499_v62 }
 0x293   : > { %v2272_v9 = vadd.f32 %v2271_v59, %v4499_v62 }
 0x294   : > { %v2344_v56 = vmax.f32 %v2270_v5, 0.0 }
 0x295   : > { %v2340_v60 = vpop.f32.mrb[12].mxu1  ;;  %v2345_v63 = vmax.f32 %v2272_v9, 0.0 }
 0x296   : > { %v3084_v61 = vpop.f32.mrb[13].mxu1  ;;  %v2341_v16 = vadd.f32 %v2340_v60, %v4499_v62 }
 0x298   : > { %v2346_v7 = vmax.f32 %v2341_v16, 0.0 }
 0x2a1   : > { %v2570_v25 = vpop.f32.mrb[14].mxu1 }
 0x2a2   : > { %v2571_v44 = vadd.f32 %v2570_v25, %v4502_v1  ;;  %v3097_v8 = vpop.f32.mrb[15].mxu1 }
 0x2a4   : > { %v2576_v10 = vadd.f32 %v2571_v44, %v2346_v7 }
 0x2a5   : > { %v2499_v11 = vpop.f32.mrb[14].mxu0 }
 0x2a6   : > { %2887 = vst.msk [vmem:[%s3846_s20 + $0x58] sm:$0xff] %vm284_vm0, %v2576_v10  ;;  %v2500_v4 = vadd.f32 %v2499_v11, %v4502_v1  ;;  %v2501_v6 = vpop.f32.mrb[15].mxu0 }
 0x2a7   : > { %v2502_v0 = vadd.f32 %v2501_v6, %v4502_v1 }
 0x2a8   : > { %v2574_v15 = vadd.f32 %v2500_v4, %v2344_v56 }
 0x2a9   : > { %v2575_v62 = vadd.f32 %v2502_v0, %v2345_v63 }
 0x2aa   : > { %2885 = vst [vmem:[%s3846_s20 + $0x48] sm:$0xff] %v2574_v15 }
 0x2ab   : > { %2886 = vst [vmem:[%s3846_s20 + $0x50] sm:$0xff] %v2575_v62 }
 0x2ac   : > { %3553 = shalt.err (!%p3550_p5)
}
 0x2ad   : > { %s3554_s20 = scalar_lea.hbm %s4548_s28, 1536  ;;  %s3558_s14 = scalar_lea.hbm %s4613_s5, 6144 }
 0x2ae   : > { %p3555_p4 = scmp.ne.s32.totalorder %s4548_s28, %s3554_s20  ;;  %p3559_p10 = scmp.lt.u32.totalorder %s4548_s28, %s4613_s5 }
 0x2af   : > { %p3560_p13 = scmp.lt.u32.totalorder %s3558_s14, %s3554_s20  ;;  %p3562_p3 = scmp.lt.u32.totalorder %s3554_s20, %s4548_s28 }
 0x2b0   : > { %p3556_p6 = pnand %p3555_p4, %p4637_p8 }
 0x2b1   : > { %p3561_p0 = por %p3560_p13, %p3559_p10 }
 0x2b2   : > { %p3557_p7 = pneg %p3556_p6 }
 0x2b3   : > { %p3563_p9 = por %p3562_p3, %p3561_p0 }
 0x2b5   : > { %p3564_p11 = pnand %p3563_p9, %p3557_p7 }
 0x2b7   : > { %3567 = shalt.err (!%p3564_p11)
}
 0x2b8   : > { %s3652_s23 = smov 384   ;;  %s3653_s24 = smov 24  }
 0x2b9   : > { %3273 = dma.vmem_to_hbm [thread:$0]  (%p4637_p8), %s4550_s12, 1536, %s4548_s28, %s4556_s17, %s3652_s23, %s3652_s23, %s3653_s24  }
 0x2ba PF: > { %p3281_p12 = scmp.ge.s32.totalorder %s3636_s25, 2  ;;  %s2613_s13 = sand.u32 1, %s3608_s18  }
 0x2bb   : > { %p4638_p1 = scmp.ne.s32.totalorder %s4630_s7, 0  ;;  %s2614_s27 = scalar_lea.sflag [#allocation6], %s2613_s13 }
 0x2bd   : > { %p3276_p2 = pnand %p3281_p12, %p4638_p1 }
 0x2bf   : > { %3603 = dma.done.wait (!%p3276_p2), %s2614_s27, 1536  }
 0x2c0   : > { %3605 = vsyncadd (!%p3276_p2), %s2614_s27, 4294965760  ;;  %s18_s25 = sadd.s32 1, %s3636_s25   ;;  %s4639_s21 = sld [smem:[#allocation15_spill]] }
 0x2c1   : > { %p15_p5 = scmp.ge.s32.totalorder %s18_s25, 6   ;;  %s4640_s20 = sld [smem:[#allocation20_spill]] }
 0x2c2   : > { %s4641_s22 = sld [smem:[#allocation16_spill]]  ;;  %s4642_s6 = sld [smem:[#allocation17_spill]] }
 0x2c3   : > { %s4643_s23 = sld [smem:[#allocation18_spill]]  ;;  %s4644_s24 = sld [smem:[#allocation19_spill]] }
 0x2c4   : > { %s4645_s18 = smov %s3612_s19  ;;  %17 = sbr.rel (!%p15_p5) target bundleno = 5 (0x5), region = 102 }
 0x2c6   : > { %s4646_s19 = smov %s4639_s21 }
 0x2c8   : > { %s4647_s21 = smov %s4641_s22  ;;  %s4648_s22 = smov %s4642_s6 }
 0x2cb   :  { %2619 = vsyncpa [#allocation6], 1 }
 0x2cc   :  { %2621 = vsyncpa [#allocation6 + $0x1], 1 }
 0x2cd   :  { %2622 = vsyncmov [#allocation4] }
 0x2d0   :  { %s2623_s7 = vpop.sfrf %2622 }
 0x2d1   :  { %p2893_p8 = scmp.ne.s32.totalorder %s2623_s7, 0 }
 0x2d3   :  { %2627 = shalt.err (%p2893_p8)  }
 0x2d4   :  { %2629 = vsyncmov [#allocation4 + $0x1] }
 0x2d7   :  { %s2630_s12 = vpop.sfrf %2629 }
 0x2d8   :  { %p2894_p4 = scmp.ne.s32.totalorder %s2630_s12, 0 }
 0x2da   :  { %2634 = shalt.err (%p2894_p4)  }

</bundles_post_ra>
